<compile_context>
chip_gen: v7x
topology: tpu7x:2x2x1
jax: 0.10.0
libtpu: 0.0.40
codegen_flags: <defaults>
</compile_context>

<pallas_src>
import functools

import jax
import jax.numpy as jnp
import numpy as np
from jax.experimental import pallas as pl
from jax.experimental.pallas import tpu as pltpu


# ----------------------------- Pallas kernel -------------------------------- #

def _fused_kernel(x_ref, w1_ref, b1_ref, w2_ref, b2_ref,
                  wf1_ref, bf1_ref, wf2_ref, bf2_ref, wf3_ref, bf3_ref, o_ref):
    _, bt, _ = x_ref.shape            # x: [7, bt, 256]
    rows = 7 * bt

    # ---- conv1 (+ReLU): one block-structured MXU matmul over all 4 parity phases
    a1 = jnp.dot(x_ref[...].reshape(rows, 256), w1_ref[...],
                 preferred_element_type=jnp.float32) + b1_ref[...]
    a1 = jnp.maximum(a1, 0.0).reshape(7, bt, 512)

    # per-phase activations (lane = plane_col*16 + channel, shift already applied)
    act00 = a1[:, :, 0:128]      # phase (oh even, ow even) -> plane P11, rows 0..6
    act01 = a1[:, :, 128:256]    # phase (even, odd)        -> plane P10, rows 0..6
    act10 = a1[:, :, 256:384]    # phase (odd,  even)       -> plane P01, rows 1..7
    act11 = a1[:, :, 384:512]    # phase (odd,  odd)        -> plane P00, rows 1..7

    zrow = jnp.zeros((1, bt, 128), jnp.float32)
    # conv2 lhs pieces = parity-plane row slices (leading-dim slices + aligned concats)
    lhs2 = jnp.concatenate([
        jnp.concatenate([zrow, act11[:6]], axis=0),   # P00[a]
        act11,                                        # P00[a+1]
        jnp.concatenate([zrow, act10[:6]], axis=0),   # P01[a]
        act10,                                        # P01[a+1]
        act01,                                        # P10[a]
        act00,                                        # P11[a]
    ], axis=-1).reshape(rows, 768)

    # ---- conv2 (+ReLU): one block-banded MXU matmul (all 9 taps folded into K=768)
    a2 = jnp.dot(lhs2, w2_ref[...], preferred_element_type=jnp.float32) + b2_ref[...]
    a2 = jnp.maximum(a2, 0.0).reshape(7, bt, 256)     # rows=oh2, lane=ow2*32+c2

    # ---- flatten: 128-aligned lane concat of the 7 output rows -> [bt, 1792]
    feat = jnp.concatenate([a2[a] for a in range(7)], axis=-1)

    # ---- MLP head + log_softmax (nf / 10 padded to 128 lanes)
    h = jnp.dot(feat, wf1_ref[...], preferred_element_type=jnp.float32) + bf1_ref[...]
    h = jnp.maximum(h, 0.0)
    h = jnp.dot(h, wf2_ref[...], preferred_element_type=jnp.float32) + bf2_ref[...]
    h = jnp.maximum(h, 0.0)
    z = jnp.dot(h, wf3_ref[...], preferred_element_type=jnp.float32) + bf3_ref[...]
    # padded logit lanes carry bias -1e30 -> vanish in the softmax
    m = jnp.max(z, axis=-1, keepdims=True)
    lse = m + jnp.log(jnp.sum(jnp.exp(z - m), axis=-1, keepdims=True))
    o_ref[...] = z - lse


def _fused_call(patches, pp, *, bt):
    b_pad = patches.shape[1]
    grid = (b_pad // bt,)

    def full(*shape):
        return pl.BlockSpec(shape, lambda i, _s=shape: tuple(0 for _ in _s))

    return pl.pallas_call(
        _fused_kernel,
        out_shape=jax.ShapeDtypeStruct((b_pad, 128), jnp.float32),
        grid=grid,
        in_specs=[
            pl.BlockSpec((7, bt, 256), lambda i: (0, i, 0)),
            full(256, 512), full(1, 512),          # conv1
            full(768, 256), full(1, 256),          # conv2
            full(1792, 128), full(1, 128),         # fc1
            full(128, 128), full(1, 128),          # fc2
            full(128, 128), full(1, 128),          # fc3
        ],
        out_specs=pl.BlockSpec((bt, 128), lambda i: (i, 0)),
        compiler_params=pltpu.CompilerParams(
            dimension_semantics=("parallel",),
            vmem_limit_bytes=48 * 1024 * 1024,
        ),
    )(patches, pp["w1"], pp["b1"], pp["w2"], pp["b2"],
      pp["wf1"], pp["bf1"], pp["wf2"], pp["bf2"], pp["wf3"], pp["bf3"])


# ------------------------------ JAX glue ------------------------------------ #

def _round_up(n, m):
    return ((n + m - 1) // m) * m


def _build_patches(x, b_pad):
    """x: [B,1,28,28] -> parity-grouped conv1 im2col [7, b_pad, 256] (lane dense)."""
    B = x.shape[0]
    xs = x.reshape(B, 28, 28)
    if b_pad > B:
        xs = jnp.concatenate([xs, jnp.zeros((b_pad - B, 28, 28), xs.dtype)], axis=0)
    xp = jnp.pad(xs, ((0, 0), (1, 1), (1, 1)))                           # [Bp,30,30]
    taps = jnp.stack([xp[:, i:i + 28:2, j:j + 28:2]
                      for i in range(3) for j in range(3)], axis=-1)     # [Bp,14,14,9]
    # oh = 2k + r, ow = 2l + s ; lane = (2r+s)*63 + l*9 + (3i+j)
    t = taps.reshape(b_pad, 7, 2, 7, 2, 9).transpose(1, 0, 2, 4, 3, 5)   # [7,Bp,2,2,7,9]
    t = t.reshape(7, b_pad, 252)
    return jnp.pad(t, ((0, 0), (0, 0), (0, 4)))                          # [7,Bp,256]


def cnn_dnn_forward(x, pp, block_b=128):
    """x: [B, 1, 28, 28] -> log-probs [B, 10]."""
    assert block_b >= 8 and block_b % 8 == 0
    B = x.shape[0]
    bt = min(block_b, _round_up(B, 8))            # batch tile (multiple of 8)
    b_pad = _round_up(B, bt)
    patches = _build_patches(x.astype(jnp.float32), b_pad)
    logp = _fused_call(patches, pp, bt=bt)        # [b_pad, 128]
    return logp[:B, :10]


# ------------------------------ params --------------------------------------- #

def init_params(nf=8, seed=0):
    key = jax.random.PRNGKey(seed)
    ks = jax.random.split(key, 10)

    def u(k, shape, fan_in):
        bound = 1.0 / jnp.sqrt(jnp.asarray(fan_in, jnp.float32))
        return jax.random.uniform(k, shape, jnp.float32, -bound, bound)

    return {
        "conv1_w": u(ks[0], (16, 1, 3, 3), 1 * 3 * 3),
        "conv1_b": u(ks[1], (16,), 1 * 3 * 3),
        "conv2_w": u(ks[2], (32, 16, 3, 3), 16 * 3 * 3),
        "conv2_b": u(ks[3], (32,), 16 * 3 * 3),
        "fc1_w": u(ks[4], (nf, 1568), 1568),
        "fc1_b": u(ks[5], (nf,), 1568),
        "fc2_w": u(ks[6], (nf, nf), nf),
        "fc2_b": u(ks[7], (nf,), nf),
        "fc3_w": u(ks[8], (10, nf), nf),
        "fc3_b": u(ks[9], (10,), nf),
    }


def prepare_params(params):
    """One-time repack of PyTorch-layout params into the kernel's lane-dense layouts."""
    nf = params["fc1_w"].shape[0]
    assert nf <= 128
    w1 = np.asarray(params["conv1_w"], np.float32)       # [16, 1, 3, 3]
    b1 = np.asarray(params["conv1_b"], np.float32)
    w2 = np.asarray(params["conv2_w"], np.float32)       # [32, 16, 3, 3]
    b2 = np.asarray(params["conv2_b"], np.float32)

    # conv1 block weight [256, 512]:
    #   row  = phase*63 + l*9 + (3i+j)        (phase = 2*(oh%2) + (ow%2))
    #   col  = phase*128 + (l + ow%2)*16 + c  (column shift into the parity plane)
    W1 = np.zeros((256, 512), np.float32)
    B1 = np.zeros((1, 512), np.float32)
    for r in range(2):
        for s in range(2):
            ph = 2 * r + s
            for l in range(7):
                c0 = ph * 128 + (l + s) * 16
                B1[0, c0:c0 + 16] = b1
                for i in range(3):
                    for j in range(3):
                        W1[ph * 63 + l * 9 + 3 * i + j, c0:c0 + 16] = w1[:, 0, i, j]

    # conv2 block-banded weight [768, 256]: six (parity-plane, row-offset) pieces,
    # each piece has a diagonal (same ow chunk) and possibly a super-diagonal
    # (ow chunk b+1 -> b) block of [16(c1), 32(c2)].
    pieces = [((0, 0), (0, 2)),   # P00[a]
              ((2, 0), (2, 2)),   # P00[a+1]
              ((0, 1), None),     # P01[a]
              ((2, 1), None),     # P01[a+1]
              ((1, 0), (1, 2)),   # P10[a]
              ((1, 1), None)]     # P11[a]
    W2 = np.zeros((768, 256), np.float32)
    for pc, (diag, sup) in enumerate(pieces):
        di, dj = diag
        for b in range(7):
            W2[pc * 128 + b * 16: pc * 128 + (b + 1) * 16,
               b * 32:(b + 1) * 32] = w2[:, :, di, dj].T
            if sup is not None:
                si, sj = sup
                W2[pc * 128 + (b + 1) * 16: pc * 128 + (b + 2) * 16,
                   b * 32:(b + 1) * 32] = w2[:, :, si, sj].T
    B2 = np.zeros((1, 256), np.float32)
    B2[0, :224] = np.tile(b2, 7)                         # ow=7 padding chunk stays 0

    # fc1: rows = oh*256 + ow*32 + c2 (ow=7 rows stay zero), cols padded nf->128
    f1 = np.asarray(params["fc1_w"], np.float32).reshape(nf, 32, 7, 7)   # [nf,c2,oh,ow]
    WF1 = np.zeros((7, 8, 32, 128), np.float32)
    WF1[:, :7, :, :nf] = np.transpose(f1, (2, 3, 1, 0))                  # [oh,ow,c2,nf]
    WF1 = WF1.reshape(1792, 128)
    BF1 = np.zeros((1, 128), np.float32)
    BF1[0, :nf] = np.asarray(params["fc1_b"], np.float32)

    WF2 = np.zeros((128, 128), np.float32)
    WF2[:nf, :nf] = np.asarray(params["fc2_w"], np.float32).T
    BF2 = np.zeros((1, 128), np.float32)
    BF2[0, :nf] = np.asarray(params["fc2_b"], np.float32)

    WF3 = np.zeros((128, 128), np.float32)
    WF3[:nf, :10] = np.asarray(params["fc3_w"], np.float32).T
    BF3 = np.full((1, 128), -1e30, np.float32)           # padded logits -> -inf-ish
    BF3[0, :10] = np.asarray(params["fc3_b"], np.float32)

    packed = dict(w1=W1, b1=B1, w2=W2, b2=B2, wf1=WF1, bf1=BF1,
                  wf2=WF2, bf2=BF2, wf3=WF3, bf3=BF3)
    return {k: jnp.asarray(v) for k, v in packed.items()}


# ------------------------------ reference ------------------------------------ #

def _reference_forward(x, params):
    hp = jax.lax.Precision.HIGHEST

    def conv(z, w, b):
        y = jax.lax.conv_general_dilated(
            z, w, window_strides=(2, 2), padding=((1, 1), (1, 1)),
            dimension_numbers=("NCHW", "OIHW", "NCHW"), precision=hp)
        return jax.nn.relu(y + b.reshape(1, -1, 1, 1))

    y = conv(x, params["conv1_w"], params["conv1_b"])
    y = conv(y, params["conv2_w"], params["conv2_b"])
    f = y.reshape(y.shape[0], -1)
    h = jax.nn.relu(jnp.dot(f, params["fc1_w"].T, precision=hp) + params["fc1_b"])
    h = jax.nn.relu(jnp.dot(h, params["fc2_w"].T, precision=hp) + params["fc2_b"])
    z = jnp.dot(h, params["fc3_w"].T, precision=hp) + params["fc3_b"]
    return jax.nn.log_softmax(z, axis=-1)


# TODO(synk): the PyTorch module's dnn_activations / retain_grad bookkeeping is
# training-time introspection with no effect on the forward pass; not implemented.

if __name__ == "__main__":
    params = init_params(nf=8, seed=0)
    prepped = prepare_params(params)

    key = jax.random.PRNGKey(0)
    k1, k2 = jax.random.split(key)
    # Linear(1568, nf) implies a 1x28x28 input (MNIST-like): 32 * 7 * 7 = 1568.
    x = jax.random.normal(k1, (2, 1, 28, 28), dtype=jnp.float32)

    fwd = jax.jit(cnn_dnn_forward, static_argnames=("block_b",))
    out = jax.block_until_ready(fwd(x, prepped))

    assert out.shape == (2, 10)
    # log_softmax rows sum to ~1 in prob space
    assert jnp.allclose(jnp.sum(jnp.exp(out), axis=1), 1.0, atol=1e-4)
    ref = _reference_forward(x, params)
    assert jnp.allclose(out, ref, atol=2e-3, rtol=2e-3), float(jnp.max(jnp.abs(out - ref)))

    # B > 8 with a multi-step grid (exercises batch tiling / padding / biases).
    x2 = jax.random.normal(k2, (16, 1, 28, 28), dtype=jnp.float32)
    out2 = jax.block_until_ready(fwd(x2, prepped, block_b=8))
    ref2 = _reference_forward(x2, params)
    assert out2.shape == (16, 10)
    assert jnp.allclose(out2, ref2, atol=2e-3, rtol=2e-3), \
        float(jnp.max(jnp.abs(out2 - ref2)))

    print("KERNEL_OK")
</pallas_src>

<mosaic_0001>
module attributes {stable_mosaic.version = 11 : i64} {
  func.func @_fused_kernel(%arg0: i32, %arg1: memref<7x8x256xf32, #tpu.memory_space<vmem>>, %arg2: memref<256x512xf32, #tpu.memory_space<vmem>>, %arg3: memref<1x512xf32, #tpu.memory_space<vmem>>, %arg4: memref<768x256xf32, #tpu.memory_space<vmem>>, %arg5: memref<1x256xf32, #tpu.memory_space<vmem>>, %arg6: memref<1792x128xf32, #tpu.memory_space<vmem>>, %arg7: memref<1x128xf32, #tpu.memory_space<vmem>>, %arg8: memref<128x128xf32, #tpu.memory_space<vmem>>, %arg9: memref<1x128xf32, #tpu.memory_space<vmem>>, %arg10: memref<128x128xf32, #tpu.memory_space<vmem>>, %arg11: memref<1x128xf32, #tpu.memory_space<vmem>>, %arg12: memref<8x128xf32, #tpu.memory_space<vmem>>) attributes {dimension_semantics = [#tpu.dimension_semantics<parallel>], iteration_bounds = array<i64: 1>, scalar_prefetch = 0 : i64, scratch_operands = 0 : i64, tpu.core_type = #tpu.core_type<tc>, window_params = [{transform_indices = @transform_0, window_bounds = array<i64: 7, 8, 256>}, {pipeline_mode = #tpu.pipeline_mode<synchronous>, transform_indices = @transform_1, window_bounds = array<i64: 256, 512>}, {pipeline_mode = #tpu.pipeline_mode<synchronous>, transform_indices = @transform_2, window_bounds = array<i64: 1, 512>}, {pipeline_mode = #tpu.pipeline_mode<synchronous>, transform_indices = @transform_3, window_bounds = array<i64: 768, 256>}, {pipeline_mode = #tpu.pipeline_mode<synchronous>, transform_indices = @transform_4, window_bounds = array<i64: 1, 256>}, {pipeline_mode = #tpu.pipeline_mode<synchronous>, transform_indices = @transform_5, window_bounds = array<i64: 1792, 128>}, {pipeline_mode = #tpu.pipeline_mode<synchronous>, transform_indices = @transform_6, window_bounds = array<i64: 1, 128>}, {pipeline_mode = #tpu.pipeline_mode<synchronous>, transform_indices = @transform_7, window_bounds = array<i64: 128, 128>}, {pipeline_mode = #tpu.pipeline_mode<synchronous>, transform_indices = @transform_8, window_bounds = array<i64: 1, 128>}, {pipeline_mode = #tpu.pipeline_mode<synchronous>, transform_indices = @transform_9, window_bounds = array<i64: 128, 128>}, {pipeline_mode = #tpu.pipeline_mode<synchronous>, transform_indices = @transform_10, window_bounds = array<i64: 1, 128>}, {transform_indices = @transform_11, window_bounds = array<i64: 8, 128>}]} {
    %c0 = arith.constant 0 : index
    %c0_0 = arith.constant 0 : index
    %c0_1 = arith.constant 0 : index
    %0 = vector.load %arg1[%c0, %c0_0, %c0_1] : memref<7x8x256xf32, #tpu.memory_space<vmem>>, vector<7x8x256xf32>
    %1 = vector.shape_cast %0 : vector<7x8x256xf32> to vector<56x256xf32>
    %c0_2 = arith.constant 0 : index
    %c0_3 = arith.constant 0 : index
    %2 = vector.load %arg2[%c0_2, %c0_3] : memref<256x512xf32, #tpu.memory_space<vmem>>, vector<256x512xf32>
    %cst = arith.constant dense<0.000000e+00> : vector<56x512xf32>
    %3 = tpu.matmul %1, %2, %cst {dimension_numbers = #tpu.dot_dimension_numbers<[1], [0], [0], [1], [0, 0, 1, 1], [], []>} : vector<56x256xf32>, vector<256x512xf32>, vector<56x512xf32> -> vector<56x512xf32>
    %c0_4 = arith.constant 0 : index
    %c0_5 = arith.constant 0 : index
    %4 = vector.load %arg3[%c0_4, %c0_5] : memref<1x512xf32, #tpu.memory_space<vmem>>, vector<1x512xf32>
    %5 = vector.broadcast %4 : vector<1x512xf32> to vector<56x512xf32>
    %6 = arith.addf %3, %5 : vector<56x512xf32>
    %cst_6 = arith.constant 0.000000e+00 : f32
    %7 = vector.broadcast %cst_6 : f32 to vector<56x512xf32>
    %8 = arith.maximumf %6, %7 : vector<56x512xf32>
    %9 = vector.shape_cast %8 : vector<56x512xf32> to vector<7x8x512xf32>
    %10 = vector.extract_strided_slice %9 {offsets = [0, 0, 0], sizes = [7, 8, 128], strides = [1, 1, 1]} : vector<7x8x512xf32> to vector<7x8x128xf32>
    %11 = vector.extract_strided_slice %9 {offsets = [0, 0, 128], sizes = [7, 8, 128], strides = [1, 1, 1]} : vector<7x8x512xf32> to vector<7x8x128xf32>
    %12 = vector.extract_strided_slice %9 {offsets = [0, 0, 256], sizes = [7, 8, 128], strides = [1, 1, 1]} : vector<7x8x512xf32> to vector<7x8x128xf32>
    %13 = vector.extract_strided_slice %9 {offsets = [0, 0, 384], sizes = [7, 8, 128], strides = [1, 1, 1]} : vector<7x8x512xf32> to vector<7x8x128xf32>
    %cst_7 = arith.constant 0.000000e+00 : f32
    %14 = vector.broadcast %cst_7 : f32 to vector<1x8x128xf32>
    %15 = vector.extract_strided_slice %13 {offsets = [0, 0, 0], sizes = [6, 8, 128], strides = [1, 1, 1]} : vector<7x8x128xf32> to vector<6x8x128xf32>
    %16 = tpu.concatenate %14, %15 in 0 : vector<1x8x128xf32>, vector<6x8x128xf32> -> vector<7x8x128xf32>
    %17 = vector.extract_strided_slice %12 {offsets = [0, 0, 0], sizes = [6, 8, 128], strides = [1, 1, 1]} : vector<7x8x128xf32> to vector<6x8x128xf32>
    %18 = tpu.concatenate %14, %17 in 0 : vector<1x8x128xf32>, vector<6x8x128xf32> -> vector<7x8x128xf32>
    %19 = tpu.concatenate %16, %13, %18, %12, %11, %10 in 2 : vector<7x8x128xf32>, vector<7x8x128xf32>, vector<7x8x128xf32>, vector<7x8x128xf32>, vector<7x8x128xf32>, vector<7x8x128xf32> -> vector<7x8x768xf32>
    %20 = vector.shape_cast %19 : vector<7x8x768xf32> to vector<56x768xf32>
    %c0_8 = arith.constant 0 : index
    %c0_9 = arith.constant 0 : index
    %21 = vector.load %arg4[%c0_8, %c0_9] : memref<768x256xf32, #tpu.memory_space<vmem>>, vector<768x256xf32>
    %cst_10 = arith.constant dense<0.000000e+00> : vector<56x256xf32>
    %22 = tpu.matmul %20, %21, %cst_10 {dimension_numbers = #tpu.dot_dimension_numbers<[1], [0], [0], [1], [0, 0, 1, 1], [], []>} : vector<56x768xf32>, vector<768x256xf32>, vector<56x256xf32> -> vector<56x256xf32>
    %c0_11 = arith.constant 0 : index
    %c0_12 = arith.constant 0 : index
    %23 = vector.load %arg5[%c0_11, %c0_12] : memref<1x256xf32, #tpu.memory_space<vmem>>, vector<1x256xf32>
    %24 = vector.broadcast %23 : vector<1x256xf32> to vector<56x256xf32>
    %25 = arith.addf %22, %24 : vector<56x256xf32>
    %cst_13 = arith.constant 0.000000e+00 : f32
    %26 = vector.broadcast %cst_13 : f32 to vector<56x256xf32>
    %27 = arith.maximumf %25, %26 : vector<56x256xf32>
    %28 = vector.shape_cast %27 : vector<56x256xf32> to vector<7x8x256xf32>
    %29 = vector.extract_strided_slice %28 {offsets = [0, 0, 0], sizes = [1, 8, 256], strides = [1, 1, 1]} : vector<7x8x256xf32> to vector<1x8x256xf32>
    %30 = vector.shape_cast %29 : vector<1x8x256xf32> to vector<8x256xf32>
    %31 = vector.extract_strided_slice %28 {offsets = [1, 0, 0], sizes = [1, 8, 256], strides = [1, 1, 1]} : vector<7x8x256xf32> to vector<1x8x256xf32>
    %32 = vector.shape_cast %31 : vector<1x8x256xf32> to vector<8x256xf32>
    %33 = vector.extract_strided_slice %28 {offsets = [2, 0, 0], sizes = [1, 8, 256], strides = [1, 1, 1]} : vector<7x8x256xf32> to vector<1x8x256xf32>
    %34 = vector.shape_cast %33 : vector<1x8x256xf32> to vector<8x256xf32>
    %35 = vector.extract_strided_slice %28 {offsets = [3, 0, 0], sizes = [1, 8, 256], strides = [1, 1, 1]} : vector<7x8x256xf32> to vector<1x8x256xf32>
    %36 = vector.shape_cast %35 : vector<1x8x256xf32> to vector<8x256xf32>
    %37 = vector.extract_strided_slice %28 {offsets = [4, 0, 0], sizes = [1, 8, 256], strides = [1, 1, 1]} : vector<7x8x256xf32> to vector<1x8x256xf32>
    %38 = vector.shape_cast %37 : vector<1x8x256xf32> to vector<8x256xf32>
    %39 = vector.extract_strided_slice %28 {offsets = [5, 0, 0], sizes = [1, 8, 256], strides = [1, 1, 1]} : vector<7x8x256xf32> to vector<1x8x256xf32>
    %40 = vector.shape_cast %39 : vector<1x8x256xf32> to vector<8x256xf32>
    %41 = vector.extract_strided_slice %28 {offsets = [6, 0, 0], sizes = [1, 8, 256], strides = [1, 1, 1]} : vector<7x8x256xf32> to vector<1x8x256xf32>
    %42 = vector.shape_cast %41 : vector<1x8x256xf32> to vector<8x256xf32>
    %43 = tpu.concatenate %30, %32, %34, %36, %38, %40, %42 in 1 : vector<8x256xf32>, vector<8x256xf32>, vector<8x256xf32>, vector<8x256xf32>, vector<8x256xf32>, vector<8x256xf32>, vector<8x256xf32> -> vector<8x1792xf32>
    %c0_14 = arith.constant 0 : index
    %c0_15 = arith.constant 0 : index
    %44 = vector.load %arg6[%c0_14, %c0_15] : memref<1792x128xf32, #tpu.memory_space<vmem>>, vector<1792x128xf32>
    %cst_16 = arith.constant dense<0.000000e+00> : vector<8x128xf32>
    %45 = tpu.matmul %43, %44, %cst_16 {dimension_numbers = #tpu.dot_dimension_numbers<[1], [0], [0], [1], [0, 0, 1, 1], [], []>} : vector<8x1792xf32>, vector<1792x128xf32>, vector<8x128xf32> -> vector<8x128xf32>
    %c0_17 = arith.constant 0 : index
    %c0_18 = arith.constant 0 : index
    %46 = vector.load %arg7[%c0_17, %c0_18] : memref<1x128xf32, #tpu.memory_space<vmem>>, vector<1x128xf32>
    %47 = vector.broadcast %46 : vector<1x128xf32> to vector<8x128xf32>
    %48 = arith.addf %45, %47 : vector<8x128xf32>
    %cst_19 = arith.constant 0.000000e+00 : f32
    %49 = vector.broadcast %cst_19 : f32 to vector<8x128xf32>
    %50 = arith.maximumf %48, %49 : vector<8x128xf32>
    %c0_20 = arith.constant 0 : index
    %c0_21 = arith.constant 0 : index
    %51 = vector.load %arg8[%c0_20, %c0_21] : memref<128x128xf32, #tpu.memory_space<vmem>>, vector<128x128xf32>
    %cst_22 = arith.constant dense<0.000000e+00> : vector<8x128xf32>
    %52 = tpu.matmul %50, %51, %cst_22 {dimension_numbers = #tpu.dot_dimension_numbers<[1], [0], [0], [1], [0, 0, 1, 1], [], []>} : vector<8x128xf32>, vector<128x128xf32>, vector<8x128xf32> -> vector<8x128xf32>
    %c0_23 = arith.constant 0 : index
    %c0_24 = arith.constant 0 : index
    %53 = vector.load %arg9[%c0_23, %c0_24] : memref<1x128xf32, #tpu.memory_space<vmem>>, vector<1x128xf32>
    %54 = vector.broadcast %53 : vector<1x128xf32> to vector<8x128xf32>
    %55 = arith.addf %52, %54 : vector<8x128xf32>
    %cst_25 = arith.constant 0.000000e+00 : f32
    %56 = vector.broadcast %cst_25 : f32 to vector<8x128xf32>
    %57 = arith.maximumf %55, %56 : vector<8x128xf32>
    %c0_26 = arith.constant 0 : index
    %c0_27 = arith.constant 0 : index
    %58 = vector.load %arg10[%c0_26, %c0_27] : memref<128x128xf32, #tpu.memory_space<vmem>>, vector<128x128xf32>
    %cst_28 = arith.constant dense<0.000000e+00> : vector<8x128xf32>
    %59 = tpu.matmul %57, %58, %cst_28 {dimension_numbers = #tpu.dot_dimension_numbers<[1], [0], [0], [1], [0, 0, 1, 1], [], []>} : vector<8x128xf32>, vector<128x128xf32>, vector<8x128xf32> -> vector<8x128xf32>
    %c0_29 = arith.constant 0 : index
    %c0_30 = arith.constant 0 : index
    %60 = vector.load %arg11[%c0_29, %c0_30] : memref<1x128xf32, #tpu.memory_space<vmem>>, vector<1x128xf32>
    %61 = vector.broadcast %60 : vector<1x128xf32> to vector<8x128xf32>
    %62 = arith.addf %59, %61 : vector<8x128xf32>
    %cst_31 = arith.constant dense<0xFF800000> : vector<8xf32>
    %63 = vector.multi_reduction <maximumf>, %62, %cst_31 [1] : vector<8x128xf32> to vector<8xf32>
    %64 = vector.shape_cast %63 : vector<8xf32> to vector<8x1xf32>
    %65 = vector.broadcast %64 : vector<8x1xf32> to vector<8x128xf32>
    %66 = arith.subf %62, %65 : vector<8x128xf32>
    %67 = math.exp %66 : vector<8x128xf32>
    %cst_32 = arith.constant dense<0.000000e+00> : vector<8xf32>
    %68 = vector.multi_reduction <add>, %67, %cst_32 [1] : vector<8x128xf32> to vector<8xf32>
    %69 = vector.shape_cast %68 : vector<8xf32> to vector<8x1xf32>
    %70 = math.log %69 : vector<8x1xf32>
    %71 = arith.addf %64, %70 : vector<8x1xf32>
    %72 = vector.broadcast %71 : vector<8x1xf32> to vector<8x128xf32>
    %73 = arith.subf %62, %72 : vector<8x128xf32>
    %c0_33 = arith.constant 0 : index
    %c0_34 = arith.constant 0 : index
    %74 = vector.load %arg12[%c0_33, %c0_34] : memref<8x128xf32, #tpu.memory_space<vmem>>, vector<8x128xf32>
    tpu.vector_store %arg12[%c0_33, %c0_34], %73 {strides = array<i32>} : memref<8x128xf32, #tpu.memory_space<vmem>>, vector<8x128xf32>,
    return
  }
  func.func @transform_0(%arg0: i32) -> (i32, i32, i32) {
    %c0_i32 = arith.constant 0 : i32
    %c0_i32_0 = arith.constant 0 : i32
    %c0_i32_1 = arith.constant 0 : i32
    return %c0_i32, %arg0, %c0_i32_0 : i32, i32, i32
  }
  func.func @transform_1(%arg0: i32) -> (i32, i32) {
    %c0_i32 = arith.constant 0 : i32
    %c0_i32_0 = arith.constant 0 : i32
    %c0_i32_1 = arith.constant 0 : i32
    return %c0_i32, %c0_i32_0 : i32, i32
  }
  func.func @transform_2(%arg0: i32) -> (i32, i32) {
    %c0_i32 = arith.constant 0 : i32
    %c0_i32_0 = arith.constant 0 : i32
    %c0_i32_1 = arith.constant 0 : i32
    return %c0_i32, %c0_i32_0 : i32, i32
  }
  func.func @transform_3(%arg0: i32) -> (i32, i32) {
    %c0_i32 = arith.constant 0 : i32
    %c0_i32_0 = arith.constant 0 : i32
    %c0_i32_1 = arith.constant 0 : i32
    return %c0_i32, %c0_i32_0 : i32, i32
  }
  func.func @transform_4(%arg0: i32) -> (i32, i32) {
    %c0_i32 = arith.constant 0 : i32
    %c0_i32_0 = arith.constant 0 : i32
    %c0_i32_1 = arith.constant 0 : i32
    return %c0_i32, %c0_i32_0 : i32, i32
  }
  func.func @transform_5(%arg0: i32) -> (i32, i32) {
    %c0_i32 = arith.constant 0 : i32
    %c0_i32_0 = arith.constant 0 : i32
    %c0_i32_1 = arith.constant 0 : i32
    return %c0_i32, %c0_i32_0 : i32, i32
  }
  func.func @transform_6(%arg0: i32) -> (i32, i32) {
    %c0_i32 = arith.constant 0 : i32
    %c0_i32_0 = arith.constant 0 : i32
    %c0_i32_1 = arith.constant 0 : i32
    return %c0_i32, %c0_i32_0 : i32, i32
  }
  func.func @transform_7(%arg0: i32) -> (i32, i32) {
    %c0_i32 = arith.constant 0 : i32
    %c0_i32_0 = arith.constant 0 : i32
    %c0_i32_1 = arith.constant 0 : i32
    return %c0_i32, %c0_i32_0 : i32, i32
  }
  func.func @transform_8(%arg0: i32) -> (i32, i32) {
    %c0_i32 = arith.constant 0 : i32
    %c0_i32_0 = arith.constant 0 : i32
    %c0_i32_1 = arith.constant 0 : i32
    return %c0_i32, %c0_i32_0 : i32, i32
  }
  func.func @transform_9(%arg0: i32) -> (i32, i32) {
    %c0_i32 = arith.constant 0 : i32
    %c0_i32_0 = arith.constant 0 : i32
    %c0_i32_1 = arith.constant 0 : i32
    return %c0_i32, %c0_i32_0 : i32, i32
  }
  func.func @transform_10(%arg0: i32) -> (i32, i32) {
    %c0_i32 = arith.constant 0 : i32
    %c0_i32_0 = arith.constant 0 : i32
    %c0_i32_1 = arith.constant 0 : i32
    return %c0_i32, %c0_i32_0 : i32, i32
  }
  func.func @transform_11(%arg0: i32) -> (i32, i32) {
    %c0_i32 = arith.constant 0 : i32
    %c0_i32_0 = arith.constant 0 : i32
    return %arg0, %c0_i32 : i32, i32
  }
}

</mosaic_0001>

<bundles_post_ra>
// kernel: cnn_dnn_forward.1
= control target key start
LH: loop header
LB: loop body
LE: loop exit
PB: predicated region body
PF: predicated region fallthrough
CT: control target
= control target key end

     0   :  { %vm2903_vm0 = vmmov 0   ;;  %s4989_s1 = inlined_call_operand.vmem [shape: f32[256,512], index: 1, kind: input, shape index: {}]   ;;  %s4990_s0 = inlined_call_operand.vmem [shape: f32[7,8,256], index: 0, kind: input, shape index: {}]   ;;  %s4991_s3 = inlined_call_operand.vmem [shape: f32[768,256], index: 3, kind: input, shape index: {}]   ;;  %s4992_s2 = inlined_call_operand.vmem [shape: f32[1,512], index: 2, kind: input, shape index: {}]   ;;  %s4993_s5 = inlined_call_operand.vmem [shape: f32[1792,128], index: 5, kind: input, shape index: {}]   ;;  %s4994_s4 = inlined_call_operand.vmem [shape: f32[1,256], index: 4, kind: input, shape index: {}]   ;;  %s4995_s7 = inlined_call_operand.vmem [shape: f32[128,128], index: 7, kind: input, shape index: {}]   ;;  %s4996_s6 = inlined_call_operand.vmem [shape: f32[1,128], index: 6, kind: input, shape index: {}]   ;;  %s4997_s9 = inlined_call_operand.vmem [shape: f32[128,128], index: 9, kind: input, shape index: {}]   ;;  %s4998_s8 = inlined_call_operand.vmem [shape: f32[1,128], index: 8, kind: input, shape index: {}]   ;;  %s4999_s10 = inlined_call_operand.vmem [shape: f32[1,128], index: 10, kind: input, shape index: {}]   ;;  %s5000_s11 = inlined_call_operand.vmem [shape: f32[8,128], index: 11, kind: output, shape index: {}]  }
   0x1   :  { %v55_v0 = vld [vmem:[%s4989_s1 + $0x18] sm:$0xff]  ;;  %v54_v2 = vld [vmem:[%s4989_s1 + $0x10] sm:$0xff]  ;;  %v39_v41 = vld [vmem:[%s4990_s0 + $0x8] sm:$0xff] }
   0x2   :  { %v59_v1 = vld [vmem:[%s4989_s1 + $0x38] sm:$0xff]  ;;  %v58_v4 = vld [vmem:[%s4989_s1 + $0x30] sm:$0xff]  ;;  %373 = vmatprep.mubr.f32.mxu1 %v39_v41  ;;  %266 = vmatprep.mubr.f32.mxu0 %v39_v41  ;;  %v53_v50 = vld [vmem:[%s4989_s1 + $0x8] sm:$0xff] }
   0x3   :  { %v2324_v3 = vpack.c.bf16 %v59_v1, %v55_v0  ;;  %v63_v5 = vld [vmem:[%s4989_s1 + $0x58] sm:$0xff]  ;;  %v2326_v7 = vpack.c.bf16 %v58_v4, %v54_v2  ;;  %v62_v9 = vld [vmem:[%s4989_s1 + $0x50] sm:$0xff]  ;;  %v57_v51 = vld [vmem:[%s4989_s1 + $0x28] sm:$0xff] }
   0x4   :  { %v67_v6 = vld [vmem:[%s4989_s1 + $0x78] sm:$0xff]  ;;  %v66_v10 = vld [vmem:[%s4989_s1 + $0x70] sm:$0xff]  ;;  %v52_v52 = vld [vmem:[%s4989_s1] sm:$0xff]  ;;  %v2260_v53 = vpack.c.bf16 %v57_v51, %v53_v50 }
   0x5   :  { %v2328_v8 = vpack.c.bf16 %v67_v6, %v63_v5  ;;  %v71_v11 = vld [vmem:[%s4989_s1 + $0x98] sm:$0xff]  ;;  %2325 = vmatprep.subr.bf16.mxu1 %v2324_v3  ;;  %v2330_v13 = vpack.c.bf16 %v66_v10, %v62_v9  ;;  %v70_v15 = vld [vmem:[%s4989_s1 + $0x90] sm:$0xff]  ;;  %v56_v54 = vld [vmem:[%s4989_s1 + $0x20] sm:$0xff] }
   0x6   :  { %v75_v12 = vld [vmem:[%s4989_s1 + $0xb8] sm:$0xff]  ;;  %2327 = vmatpush1.bf16.msra.mxu1 %v2326_v7  ;;  %v74_v16 = vld [vmem:[%s4989_s1 + $0xb0] sm:$0xff]  ;;  %v61_v55 = vld [vmem:[%s4989_s1 + $0x48] sm:$0xff]  ;;  %v2262_v58 = vpack.c.bf16 %v56_v54, %v52_v52  ;;  %2261 = vmatprep.subr.bf16.mxu0 %v2260_v53 }
   0x7   :  { %2329 = vmatprep.subr.bf16.mxu1 %v2328_v8  ;;  %v2332_v14 = vpack.c.bf16 %v75_v12, %v71_v11  ;;  %v79_v17 = vld [vmem:[%s4989_s1 + $0xd8] sm:$0xff]  ;;  %v2334_v19 = vpack.c.bf16 %v74_v16, %v70_v15  ;;  %v78_v21 = vld [vmem:[%s4989_s1 + $0xd0] sm:$0xff]  ;;  %v65_v56 = vld [vmem:[%s4989_s1 + $0x68] sm:$0xff] }
   0x8   :  { %v83_v18 = vld [vmem:[%s4989_s1 + $0xf8] sm:$0xff]  ;;  %v82_v22 = vld [vmem:[%s4989_s1 + $0xf0] sm:$0xff]  ;;  %v2264_v59 = vpack.c.bf16 %v65_v56, %v61_v55  ;;  %v60_v60 = vld [vmem:[%s4989_s1 + $0x40] sm:$0xff]  ;;  %2263 = vmatpush1.bf16.msra.mxu0 %v2262_v58 }
   0x9   :  { %v2336_v20 = vpack.c.bf16 %v83_v18, %v79_v17  ;;  %v87_v23 = vld [vmem:[%s4989_s1 + $0x118] sm:$0xff]  ;;  %v2338_v25 = vpack.c.bf16 %v82_v22, %v78_v21  ;;  %v86_v27 = vld [vmem:[%s4989_s1 + $0x110] sm:$0xff]  ;;  %v64_v61 = vld [vmem:[%s4989_s1 + $0x60] sm:$0xff] }
   0xa   :  { %2331 = vmatpush1.bf16.msra.mxu1 %v2330_v13  ;;  %v91_v24 = vld [vmem:[%s4989_s1 + $0x138] sm:$0xff]  ;;  %v90_v28 = vld [vmem:[%s4989_s1 + $0x130] sm:$0xff]  ;;  %v69_v62 = vld [vmem:[%s4989_s1 + $0x88] sm:$0xff]  ;;  %v2266_v5 = vpack.c.bf16 %v64_v61, %v60_v60  ;;  %2265 = vmatprep.subr.bf16.mxu0 %v2264_v59 }
   0xb   :  { %2333 = vmatprep.subr.bf16.mxu1 %v2332_v14  ;;  %v2340_v26 = vpack.c.bf16 %v91_v24, %v87_v23  ;;  %v95_v29 = vld [vmem:[%s4989_s1 + $0x158] sm:$0xff]  ;;  %v2342_v31 = vpack.c.bf16 %v90_v28, %v86_v27  ;;  %v94_v33 = vld [vmem:[%s4989_s1 + $0x150] sm:$0xff]  ;;  %v73_v2 = vld [vmem:[%s4989_s1 + $0xa8] sm:$0xff] }
   0xc   :  { %v99_v30 = vld [vmem:[%s4989_s1 + $0x178] sm:$0xff]  ;;  %v98_v34 = vld [vmem:[%s4989_s1 + $0x170] sm:$0xff]  ;;  %v2268_v6 = vpack.c.bf16 %v73_v2, %v69_v62  ;;  %v68_v7 = vld [vmem:[%s4989_s1 + $0x80] sm:$0xff]  ;;  %2267 = vmatpush1.bf16.msra.mxu0 %v2266_v5 }
   0xd   :  { %v2344_v32 = vpack.c.bf16 %v99_v30, %v95_v29  ;;  %v103_v35 = vld [vmem:[%s4989_s1 + $0x198] sm:$0xff]  ;;  %v2346_v37 = vpack.c.bf16 %v98_v34, %v94_v33  ;;  %v102_v39 = vld [vmem:[%s4989_s1 + $0x190] sm:$0xff]  ;;  %v72_v8 = vld [vmem:[%s4989_s1 + $0xa0] sm:$0xff] }
   0xe   :  { %2335 = vmatpush1.bf16.msra.mxu1 %v2334_v19  ;;  %v107_v36 = vld [vmem:[%s4989_s1 + $0x1b8] sm:$0xff]  ;;  %v106_v40 = vld [vmem:[%s4989_s1 + $0x1b0] sm:$0xff]  ;;  %v77_v10 = vld [vmem:[%s4989_s1 + $0xc8] sm:$0xff]  ;;  %v2270_v17 = vpack.c.bf16 %v72_v8, %v68_v7  ;;  %2269 = vmatprep.subr.bf16.mxu0 %v2268_v6 }
   0xf   :  { %2337 = vmatprep.subr.bf16.mxu1 %v2336_v20  ;;  %v2348_v38 = vpack.c.bf16 %v107_v36, %v103_v35  ;;  %v111_v42 = vld [vmem:[%s4989_s1 + $0x1d8] sm:$0xff]  ;;  %v2350_v44 = vpack.c.bf16 %v106_v40, %v102_v39  ;;  %v110_v45 = vld [vmem:[%s4989_s1 + $0x1d0] sm:$0xff]  ;;  %v81_v11 = vld [vmem:[%s4989_s1 + $0xe8] sm:$0xff] }
  0x10   :  { %v115_v43 = vld [vmem:[%s4989_s1 + $0x1f8] sm:$0xff]  ;;  %v114_v47 = vld [vmem:[%s4989_s1 + $0x1f0] sm:$0xff]  ;;  %v2272_v18 = vpack.c.bf16 %v81_v11, %v77_v10  ;;  %v76_v19 = vld [vmem:[%s4989_s1 + $0xc0] sm:$0xff]  ;;  %2271 = vmatpush1.bf16.msra.mxu0 %v2270_v17 }
  0x11   :  { %v2352_v46 = vpack.c.bf16 %v115_v43, %v111_v42  ;;  %v119_v48 = vld [vmem:[%s4989_s1 + $0x218] sm:$0xff]  ;;  %v2354_v57 = vpack.c.bf16 %v114_v47, %v110_v45  ;;  %v118_v0 = vld [vmem:[%s4989_s1 + $0x210] sm:$0xff]  ;;  %v80_v20 = vld [vmem:[%s4989_s1 + $0xe0] sm:$0xff] }
  0x12   :  { %2339 = vmatpush1.bf16.msra.mxu1 %v2338_v25  ;;  %v123_v49 = vld [vmem:[%s4989_s1 + $0x238] sm:$0xff]  ;;  %v122_v1 = vld [vmem:[%s4989_s1 + $0x230] sm:$0xff]  ;;  %v85_v22 = vld [vmem:[%s4989_s1 + $0x108] sm:$0xff]  ;;  %v2274_v29 = vpack.c.bf16 %v80_v20, %v76_v19  ;;  %2273 = vmatprep.subr.bf16.mxu0 %v2272_v18 }
  0x13   :  { %2341 = vmatprep.subr.bf16.mxu1 %v2340_v26  ;;  %v2356_v63 = vpack.c.bf16 %v123_v49, %v119_v48  ;;  %v127_v3 = vld [vmem:[%s4989_s1 + $0x258] sm:$0xff]  ;;  %v2358_v9 = vpack.c.bf16 %v122_v1, %v118_v0  ;;  %v126_v13 = vld [vmem:[%s4989_s1 + $0x250] sm:$0xff]  ;;  %v89_v23 = vld [vmem:[%s4989_s1 + $0x128] sm:$0xff] }
  0x14   :  { %v131_v4 = vld [vmem:[%s4989_s1 + $0x278] sm:$0xff]  ;;  %v130_v14 = vld [vmem:[%s4989_s1 + $0x270] sm:$0xff]  ;;  %v2276_v30 = vpack.c.bf16 %v89_v23, %v85_v22  ;;  %v93_v34 = vld [vmem:[%s4989_s1 + $0x148] sm:$0xff]  ;;  %2275 = vmatpush1.bf16.msra.mxu0 %v2274_v29 }
  0x15   :  { %v2360_v12 = vpack.c.bf16 %v131_v4, %v127_v3  ;;  %v135_v15 = vld [vmem:[%s4989_s1 + $0x298] sm:$0xff]  ;;  %v2362_v21 = vpack.c.bf16 %v130_v14, %v126_v13  ;;  %v134_v25 = vld [vmem:[%s4989_s1 + $0x290] sm:$0xff]  ;;  %v97_v35 = vld [vmem:[%s4989_s1 + $0x168] sm:$0xff] }
  0x16   :  { %2343 = vmatpush1.bf16.msra.mxu1 %v2342_v31  ;;  %v139_v16 = vld [vmem:[%s4989_s1 + $0x2b8] sm:$0xff]  ;;  %v138_v26 = vld [vmem:[%s4989_s1 + $0x2b0] sm:$0xff]  ;;  %v84_v31 = vld [vmem:[%s4989_s1 + $0x100] sm:$0xff]  ;;  %2277 = vmatprep.subr.bf16.mxu0 %v2276_v30  ;;  %v2280_v42 = vpack.c.bf16 %v97_v35, %v93_v34 }
  0x17   :  { %2345 = vmatprep.subr.bf16.mxu1 %v2344_v32  ;;  %v2364_v24 = vpack.c.bf16 %v139_v16, %v135_v15  ;;  %v143_v27 = vld [vmem:[%s4989_s1 + $0x2d8] sm:$0xff]  ;;  %v88_v32 = vld [vmem:[%s4989_s1 + $0x120] sm:$0xff]  ;;  %v2366_v33 = vpack.c.bf16 %v138_v26, %v134_v25  ;;  %v105_v47 = vld [vmem:[%s4989_s1 + $0x1a8] sm:$0xff] }
  0x18   :  { %v147_v28 = vld [vmem:[%s4989_s1 + $0x2f8] sm:$0xff]  ;;  %v2278_v41 = vpack.c.bf16 %v88_v32, %v84_v31  ;;  %v92_v43 = vld [vmem:[%s4989_s1 + $0x140] sm:$0xff]  ;;  %v150_v49 = vld [vmem:[%s4989_s1 + $0x310] sm:$0xff] }
  0x19   :  { %v2368_v36 = vpack.c.bf16 %v147_v28, %v143_v27  ;;  %v151_v39 = vld [vmem:[%s4989_s1 + $0x318] sm:$0xff]  ;;  %v154_v50 = vld [vmem:[%s4989_s1 + $0x330] sm:$0xff]  ;;  %v100_v55 = vld [vmem:[%s4989_s1 + $0x180] sm:$0xff] }
  0x1a   :  { %2347 = vmatpush1.bf16.msra.mxu1 %v2346_v37  ;;  %v142_v37 = vld [vmem:[%s4989_s1 + $0x2d0] sm:$0xff]  ;;  %v155_v40 = vld [vmem:[%s4989_s1 + $0x338] sm:$0xff]  ;;  %2279 = vmatpush1.bf16.msra.mxu0 %v2278_v41  ;;  %v104_v56 = vld [vmem:[%s4989_s1 + $0x1a0] sm:$0xff] }
  0x1b   :  { %2349 = vmatprep.subr.bf16.mxu1 %v2348_v38  ;;  %v146_v38 = vld [vmem:[%s4989_s1 + $0x2f0] sm:$0xff]  ;;  %v2372_v48 = vpack.c.bf16 %v155_v40, %v151_v39  ;;  %v159_v51 = vld [vmem:[%s4989_s1 + $0x358] sm:$0xff]  ;;  %2281 = vmatprep.subr.bf16.mxu0 %v2280_v42  ;;  %v109_v58 = vld [vmem:[%s4989_s1 + $0x1c8] sm:$0xff]  ;;  %v2286_v1 = vpack.c.bf16 %v104_v56, %v100_v55 }
  0x1c   :  { %v2370_v45 = vpack.c.bf16 %v146_v38, %v142_v37  ;;  %v163_v52 = vld [vmem:[%s4989_s1 + $0x378] sm:$0xff]  ;;  %v113_v59 = vld [vmem:[%s4989_s1 + $0x1e8] sm:$0xff]  ;;  %v158_v61 = vld [vmem:[%s4989_s1 + $0x350] sm:$0xff] }
  0x1d   :  { %v2376_v60 = vpack.c.bf16 %v163_v52, %v159_v51  ;;  %v162_v62 = vld [vmem:[%s4989_s1 + $0x370] sm:$0xff]  ;;  %v171_v0 = vld [vmem:[%s4989_s1 + $0x3b8] sm:$0xff]  ;;  %v2288_v2 = vpack.c.bf16 %v113_v59, %v109_v58  ;;  %v108_v3 = vld [vmem:[%s4989_s1 + $0x1c0] sm:$0xff] }
  0x1e   :  { %2351 = vmatpush1.bf16.msra.mxu1 %v2350_v44  ;;  %v96_v44 = vld [vmem:[%s4989_s1 + $0x160] sm:$0xff]  ;;  %v2378_v5 = vpack.c.bf16 %v162_v62, %v158_v61  ;;  %v117_v6 = vld [vmem:[%s4989_s1 + $0x208] sm:$0xff]  ;;  %v170_v10 = vld [vmem:[%s4989_s1 + $0x3b0] sm:$0xff] }
  0x1f   :  { %2353 = vmatprep.subr.bf16.mxu1 %v2352_v46  ;;  %v101_v46 = vld [vmem:[%s4989_s1 + $0x188] sm:$0xff]  ;;  %v2282_v53 = vpack.c.bf16 %v96_v44, %v92_v43  ;;  %v112_v4 = vld [vmem:[%s4989_s1 + $0x1e0] sm:$0xff]  ;;  %v175_v11 = vld [vmem:[%s4989_s1 + $0x3d8] sm:$0xff] }
  0x20   :  { %v2284_v54 = vpack.c.bf16 %v105_v47, %v101_v46  ;;  %v121_v7 = vld [vmem:[%s4989_s1 + $0x228] sm:$0xff]  ;;  %v2290_v13 = vpack.c.bf16 %v112_v4, %v108_v3  ;;  %v116_v15 = vld [vmem:[%s4989_s1 + $0x200] sm:$0xff]  ;;  %v178_v22 = vld [vmem:[%s4989_s1 + $0x3f0] sm:$0xff] }
  0x21   :  { %2283 = vmatpush1.bf16.msra.mxu0 %v2282_v53  ;;  %v2292_v14 = vpack.c.bf16 %v121_v7, %v117_v6  ;;  %v120_v16 = vld [vmem:[%s4989_s1 + $0x220] sm:$0xff]  ;;  %v125_v18 = vld [vmem:[%s4989_s1 + $0x248] sm:$0xff]  ;;  %v3305_v37 = vld [vmem:[%s4990_s0 + $0x18] sm:$0xff] }
  0x22   :  { %2355 = vmatpush1.bf16.msra.mxu1 %v2354_v57  ;;  %v2374_v57 = vpack.c.bf16 %v154_v50, %v150_v49  ;;  %2285 = vmatprep.subr.bf16.mxu0 %v2284_v54  ;;  %v129_v19 = vld [vmem:[%s4989_s1 + $0x268] sm:$0xff]  ;;  %v2294_v23 = vpack.c.bf16 %v120_v16, %v116_v15  ;;  %v124_v25 = vld [vmem:[%s4989_s1 + $0x240] sm:$0xff]  ;;  %v3318_v42 = vld [vmem:[%s4990_s0 + $0x10] sm:$0xff] }
  0x23   :  { %2357 = vmatprep.subr.bf16.mxu1 %v2356_v63  ;;  %v167_v63 = vld [vmem:[%s4989_s1 + $0x398] sm:$0xff]  ;;  %v128_v26 = vld [vmem:[%s4989_s1 + $0x260] sm:$0xff]  ;;  %v133_v28 = vld [vmem:[%s4989_s1 + $0x288] sm:$0xff] }
  0x24   :  { %v2380_v8 = vpack.c.bf16 %v171_v0, %v167_v63  ;;  %v137_v29 = vld [vmem:[%s4989_s1 + $0x2a8] sm:$0xff]  ;;  %v2298_v30 = vpack.c.bf16 %v128_v26, %v124_v25  ;;  %v132_v32 = vld [vmem:[%s4989_s1 + $0x280] sm:$0xff]  ;;  %v3353_v53 = vld [vmem:[%s4990_s0 + $0x38] sm:$0xff] }
  0x25   :  { %2287 = vmatpush1.bf16.msra.mxu0 %v2286_v1  ;;  %v2300_v31 = vpack.c.bf16 %v137_v29, %v133_v28  ;;  %v3294_v34 = vld [vmem:[%s4990_s0] sm:$0xff]  ;;  %v141_v35 = vld [vmem:[%s4989_s1 + $0x2c8] sm:$0xff]  ;;  %v3366_v58 = vld [vmem:[%s4990_s0 + $0x30] sm:$0xff] }
  0x26   :  { %2359 = vmatpush1.bf16.msra.mxu1 %v2358_v9  ;;  %v166_v9 = vld [vmem:[%s4989_s1 + $0x390] sm:$0xff]  ;;  %2289 = vmatprep.subr.bf16.mxu0 %v2288_v2  ;;  %v140_v40 = vld [vmem:[%s4989_s1 + $0x2c0] sm:$0xff]  ;;  %v149_v43 = vld [vmem:[%s4989_s1 + $0x308] sm:$0xff] }
  0x27   :  { %2361 = vmatprep.subr.bf16.mxu1 %v2360_v12  ;;  %v179_v12 = vld [vmem:[%s4989_s1 + $0x3f8] sm:$0xff]  ;;  %v2382_v17 = vpack.c.bf16 %v170_v10, %v166_v9  ;;  %v144_v41 = vld [vmem:[%s4989_s1 + $0x2e0] sm:$0xff]  ;;  %v153_v44 = vld [vmem:[%s4989_s1 + $0x328] sm:$0xff] }
  0x28   :  { %v2384_v20 = vpack.c.bf16 %v179_v12, %v175_v11  ;;  %v2306_v46 = vpack.c.bf16 %v144_v41, %v140_v40  ;;  %v2308_v47 = vpack.c.bf16 %v153_v44, %v149_v43  ;;  %v152_v49 = vld [vmem:[%s4989_s1 + $0x320] sm:$0xff]  ;;  %v157_v51 = vld [vmem:[%s4989_s1 + $0x348] sm:$0xff]  ;;  %v3414_v10 = vld [vmem:[%s4990_s0 + $0x50] sm:$0xff] }
  0x29   :  { %2291 = vmatpush1.bf16.msra.mxu0 %v2290_v13  ;;  %v3342_v50 = vld [vmem:[%s4990_s0 + $0x20] sm:$0xff]  ;;  %v161_v52 = vld [vmem:[%s4989_s1 + $0x368] sm:$0xff]  ;;  %v447_v12 = vld [vmem:[%s4991_s3 + $0x18] sm:$0xff] }
  0x2a   :  { %2363 = vmatpush1.bf16.msra.mxu1 %v2362_v21  ;;  %v174_v21 = vld [vmem:[%s4989_s1 + $0x3d0] sm:$0xff]  ;;  %2293 = vmatprep.subr.bf16.mxu0 %v2292_v14  ;;  %v2312_v55 = vpack.c.bf16 %v161_v52, %v157_v51  ;;  %v156_v56 = vld [vmem:[%s4989_s1 + $0x340] sm:$0xff]  ;;  %v165_v59 = vld [vmem:[%s4989_s1 + $0x388] sm:$0xff] }
  0x2b   :  { %2365 = vmatprep.subr.bf16.mxu1 %v2364_v24  ;;  %v2296_v24 = vpack.c.bf16 %v129_v19, %v125_v18  ;;  %v2386_v27 = vpack.c.bf16 %v178_v22, %v174_v21  ;;  %v3377_v61 = vld [vmem:[%s4990_s0 + $0x48] sm:$0xff]  ;;  %v164_v0 = vld [vmem:[%s4989_s1 + $0x380] sm:$0xff]  ;;  %v455_v26 = vld [vmem:[%s4991_s3 + $0x58] sm:$0xff] }
  0x2c   :  { %v168_v1 = vld [vmem:[%s4989_s1 + $0x3a0] sm:$0xff]  ;;  %v173_v3 = vld [vmem:[%s4989_s1 + $0x3c8] sm:$0xff]  ;;  %v467_v44 = vld [vmem:[%s4991_s3 + $0xb8] sm:$0xff] }
  0x2d   :  { %2295 = vmatpush1.bf16.msra.mxu0 %v2294_v23  ;;  %v3390_v2 = vld [vmem:[%s4990_s0 + $0x40] sm:$0xff]  ;;  %v177_v4 = vld [vmem:[%s4989_s1 + $0x3e8] sm:$0xff]  ;;  %v2318_v6 = vpack.c.bf16 %v168_v1, %v164_v0 }
  0x2e   :  { %2367 = vmatpush1.bf16.msra.mxu1 %v2366_v33  ;;  %2297 = vmatprep.subr.bf16.mxu0 %v2296_v24  ;;  %v136_v33 = vld [vmem:[%s4989_s1 + $0x2a0] sm:$0xff]  ;;  %v2320_v7 = vpack.c.bf16 %v177_v4, %v173_v3  ;;  %v445_v11 = vld [vmem:[%s4991_s3 + $0x8] sm:$0xff]  ;;  %v450_v24 = vld [vmem:[%s4991_s3 + $0x30] sm:$0xff] }
  0x2f   :  { %2369 = vmatprep.subr.bf16.mxu1 %v2368_v36  ;;  %v145_v36 = vld [vmem:[%s4989_s1 + $0x2e8] sm:$0xff]  ;;  %v2302_v38 = vpack.c.bf16 %v136_v33, %v132_v32  ;;  %v176_v9 = vld [vmem:[%s4989_s1 + $0x3e0] sm:$0xff]  ;;  %v2388_v15 = vpack.c.bf16 %v447_v12, %v445_v11  ;;  %v459_v32 = vld [vmem:[%s4991_s3 + $0x78] sm:$0xff] }
  0x30   :  { %v2304_v39 = vpack.c.bf16 %v145_v36, %v141_v35  ;;  %v3425_v13 = vld [vmem:[%s4990_s0 + $0x68] sm:$0xff]  ;;  %v444_v16 = vld [vmem:[%s4991_s3] sm:$0xff]  ;;  %v458_v36 = vld [vmem:[%s4991_s3 + $0x70] sm:$0xff] }
  0x31   :  { %2299 = vmatpush1.bf16.msra.mxu0 %v2298_v30  ;;  %v3438_v18 = vld [vmem:[%s4990_s0 + $0x60] sm:$0xff]  ;;  %v449_v19 = vld [vmem:[%s4991_s3 + $0x28] sm:$0xff]  ;;  %v454_v30 = vld [vmem:[%s4991_s3 + $0x50] sm:$0xff] }
  0x32   :  { %2371 = vmatpush1.bf16.msra.mxu1 %v2370_v45  ;;  %2301 = vmatprep.subr.bf16.mxu0 %v2300_v31  ;;  %v3329_v45 = vld [vmem:[%s4990_s0 + $0x28] sm:$0xff]  ;;  %v448_v23 = vld [vmem:[%s4991_s3 + $0x20] sm:$0xff]  ;;  %v483_v4 = vld [vmem:[%s4991_s3 + $0x138] sm:$0xff] }
  0x33   :  { %2373 = vmatprep.subr.bf16.mxu1 %v2372_v48  ;;  %v148_v48 = vld [vmem:[%s4989_s1 + $0x300] sm:$0xff]  ;;  %v453_v25 = vld [vmem:[%s4991_s3 + $0x48] sm:$0xff] }
  0x34   :  { %v2310_v54 = vpack.c.bf16 %v152_v49, %v148_v48  ;;  %v2396_v28 = vpack.c.bf16 %v455_v26, %v453_v25  ;;  %v452_v29 = vld [vmem:[%s4991_s3 + $0x40] sm:$0xff]  ;;  %v457_v31 = vld [vmem:[%s4991_s3 + $0x68] sm:$0xff]  ;;  %v466_v48 = vld [vmem:[%s4991_s3 + $0xb0] sm:$0xff] }
  0x35   :  { %2303 = vmatpush1.bf16.msra.mxu0 %v2302_v38  ;;  %v2398_v33 = vpack.c.bf16 %v454_v30, %v452_v29  ;;  %v456_v35 = vld [vmem:[%s4991_s3 + $0x60] sm:$0xff]  ;;  %v463_v38 = vld [vmem:[%s4991_s3 + $0x98] sm:$0xff]  ;;  %v465_v43 = vld [vmem:[%s4991_s3 + $0xa8] sm:$0xff] }
  0x36   :  { %2375 = vmatpush1.bf16.msra.mxu1 %v2374_v57  ;;  %2305 = vmatprep.subr.bf16.mxu0 %v2304_v39  ;;  %v160_v57 = vld [vmem:[%s4989_s1 + $0x360] sm:$0xff]  ;;  %v2402_v39 = vpack.c.bf16 %v458_v36, %v456_v35  ;;  %v469_v49 = vld [vmem:[%s4991_s3 + $0xc8] sm:$0xff]  ;;  %v494_v26 = vld [vmem:[%s4991_s3 + $0x190] sm:$0xff] }
  0x37   :  { %2377 = vmatprep.subr.bf16.mxu1 %v2376_v60  ;;  %v169_v60 = vld [vmem:[%s4989_s1 + $0x3a8] sm:$0xff]  ;;  %v2314_v62 = vpack.c.bf16 %v160_v57, %v156_v56  ;;  %v460_v41 = vld [vmem:[%s4991_s3 + $0x80] sm:$0xff]  ;;  %v475_v56 = vld [vmem:[%s4991_s3 + $0xf8] sm:$0xff] }
  0x38   :  { %v2316_v63 = vpack.c.bf16 %v169_v60, %v165_v59  ;;  %v472_v59 = vld [vmem:[%s4991_s3 + $0xe0] sm:$0xff]  ;;  %v474_v60 = vld [vmem:[%s4991_s3 + $0xf0] sm:$0xff]  ;;  %v481_v3 = vld [vmem:[%s4991_s3 + $0x128] sm:$0xff] }
  0x39   :  { %2307 = vmatpush1.bf16.msra.mxu0 %v2306_v46  ;;  %v2408_v46 = vpack.c.bf16 %v467_v44, %v465_v43  ;;  %v476_v1 = vld [vmem:[%s4991_s3 + $0x100] sm:$0xff]  ;;  %v506_v44 = vld [vmem:[%s4991_s3 + $0x1f0] sm:$0xff] }
  0x3a   :  { %2379 = vmatpush1.bf16.msra.mxu1 %v2378_v5  ;;  %2309 = vmatprep.subr.bf16.mxu0 %v2308_v47  ;;  %v3401_v5 = vld [vmem:[%s4990_s0 + $0x58] sm:$0xff]  ;;  %v464_v47 = vld [vmem:[%s4991_s3 + $0xa0] sm:$0xff] }
  0x3b   :  { %2381 = vmatprep.subr.bf16.mxu1 %v2380_v8  ;;  %v172_v8 = vld [vmem:[%s4989_s1 + $0x3c0] sm:$0xff]  ;;  %v2410_v51 = vpack.c.bf16 %v466_v48, %v464_v47  ;;  %v511_v47 = vld [vmem:[%s4991_s3 + $0x218] sm:$0xff] }
  0x3c   :  { %v2322_v14 = vpack.c.bf16 %v176_v9, %v172_v8  ;;  %v482_v8 = vld [vmem:[%s4991_s3 + $0x130] sm:$0xff]  ;;  %v485_v9 = vld [vmem:[%s4991_s3 + $0x148] sm:$0xff]  ;;  %v492_v25 = vld [vmem:[%s4991_s3 + $0x180] sm:$0xff] }
  0x3d   :  { %2311 = vmatpush1.bf16.msra.mxu0 %v2310_v54  ;;  %v470_v54 = vld [vmem:[%s4991_s3 + $0xd0] sm:$0xff]  ;;  %v2438_v29 = vpack.c.bf16 %v494_v26, %v492_v25  ;;  %v504_v43 = vld [vmem:[%s4991_s3 + $0x1e0] sm:$0xff]  ;;  %v525_v26 = vld [vmem:[%s4991_s3 + $0x288] sm:$0xff] }
  0x3e   :  { %2383 = vmatpush1.bf16.msra.mxu1 %v2382_v17  ;;  %2313 = vmatprep.subr.bf16.mxu0 %v2312_v55  ;;  %v446_v17 = vld [vmem:[%s4991_s3 + $0x10] sm:$0xff]  ;;  %v473_v55 = vld [vmem:[%s4991_s3 + $0xe8] sm:$0xff] }
  0x3f   :  { %2385 = vmatprep.subr.bf16.mxu1 %v2384_v20  ;;  %v451_v20 = vld [vmem:[%s4991_s3 + $0x38] sm:$0xff]  ;;  %v2390_v21 = vpack.c.bf16 %v446_v17, %v444_v16 }
  0x40   :  { %v2392_v22 = vpack.c.bf16 %v451_v20, %v449_v19  ;;  %v491_v16 = vld [vmem:[%s4991_s3 + $0x178] sm:$0xff]  ;;  %v488_v19 = vld [vmem:[%s4991_s3 + $0x160] sm:$0xff]  ;;  %v490_v20 = vld [vmem:[%s4991_s3 + $0x170] sm:$0xff] }
  0x41   :  { %2315 = vmatpush1.bf16.msra.mxu0 %v2314_v62  ;;  %v479_v62 = vld [vmem:[%s4991_s3 + $0x118] sm:$0xff] }
  0x42   :  { %2387 = vmatpush1.bf16.msra.mxu1 %v2386_v27  ;;  %2317 = vmatprep.subr.bf16.mxu0 %v2316_v63  ;;  %v2394_v27 = vpack.c.bf16 %v450_v24, %v448_v23  ;;  %v2418_v63 = vpack.c.bf16 %v474_v60, %v472_v59  ;;  %v2434_v23 = vpack.c.bf16 %v490_v20, %v488_v19  ;;  %v513_v59 = vld [vmem:[%s4991_s3 + $0x228] sm:$0xff]  ;;  %v515_v60 = vld [vmem:[%s4991_s3 + $0x238] sm:$0xff] }
  0x45   :  { %374 = vmatmul.mubr.f32.vlgmr.msra.gmra.mrb[0].mxu1 %v3294_v34  ;;  %2319 = vmatpush1.bf16.msra.mxu0 %v2318_v6  ;;  %v2424_v6 = vpack.c.bf16 %v483_v4, %v481_v3  ;;  %v514_v3 = vld [vmem:[%s4991_s3 + $0x230] sm:$0xff] }
  0x46   :  { %379 = vmatprep.mubr.f32.mxu1 %v3305_v37  ;;  %2321 = vmatprep.subr.bf16.mxu0 %v2320_v7  ;;  %v480_v7 = vld [vmem:[%s4991_s3 + $0x120] sm:$0xff] }
  0x47   :  { %v2426_v11 = vpack.c.bf16 %v482_v8, %v480_v7  ;;  %v2901_v7 = vmov 0.0  }
  0x49   :  { %380 = vmatmul.mubr.f32.gmra.mrb[2].mxu1 %v3318_v42  ;;  %2323 = vmatpush1.bf16.msra.mxu0 %v2322_v14  ;;  %v486_v14 = vld [vmem:[%s4991_s3 + $0x150] sm:$0xff] }
  0x4a   :  { %385 = vmatprep.mubr.f32.mxu1 %v3329_v45  ;;  %2389 = vmatprep.subr.bf16.mxu0 %v2388_v15  ;;  %v489_v15 = vld [vmem:[%s4991_s3 + $0x168] sm:$0xff] }
  0x4c   :  { %267 = vmatmul.mubr.f32.vlgmr.msra.gmra.mrb[0].mxu0 %v3294_v34  ;;  %v2400_v34 = vpack.c.bf16 %v459_v32, %v457_v31  ;;  %v496_v31 = vld [vmem:[%s4991_s3 + $0x1a0] sm:$0xff]  ;;  %v498_v32 = vld [vmem:[%s4991_s3 + $0x1b0] sm:$0xff] }
  0x4d   :  { %386 = vmatmul.mubr.f32.gmra.mrb[4].mxu1 %v3342_v50  ;;  %272 = vmatprep.mubr.f32.mxu0 %v3305_v37  ;;  %v461_v37 = vld [vmem:[%s4991_s3 + $0x88] sm:$0xff]  ;;  %v2442_v35 = vpack.c.bf16 %v498_v32, %v496_v31 }
  0x4e   :  { %391 = vmatprep.mubr.f32.mxu1 %v3353_v53  ;;  %2391 = vmatpush1.bf16.msra.mxu0 %v2390_v21  ;;  %v2404_v40 = vpack.c.bf16 %v463_v38, %v461_v37  ;;  %v493_v21 = vld [vmem:[%s4991_s3 + $0x188] sm:$0xff]  ;;  %v500_v37 = vld [vmem:[%s4991_s3 + $0x1c0] sm:$0xff]  ;;  %v502_v38 = vld [vmem:[%s4991_s3 + $0x1d0] sm:$0xff] }
  0x4f   :  { %2393 = vmatprep.subr.bf16.mxu0 %v2392_v22  ;;  %v495_v22 = vld [vmem:[%s4991_s3 + $0x198] sm:$0xff] }
  0x50   :  { %273 = vmatmul.mubr.f32.gmra.mrb[2].mxu0 %v3318_v42  ;;  %v462_v42 = vld [vmem:[%s4991_s3 + $0x90] sm:$0xff]  ;;  %v2436_v24 = vpack.c.bf16 %v495_v22, %v493_v21 }
  0x51   :  { %392 = vmatmul.mubr.f32.gmra.mrb[6].mxu1 %v3366_v58  ;;  %278 = vmatprep.mubr.f32.mxu0 %v3329_v45  ;;  %v2406_v45 = vpack.c.bf16 %v462_v42, %v460_v41  ;;  %v507_v41 = vld [vmem:[%s4991_s3 + $0x1f8] sm:$0xff] }
  0x52   :  { %397 = vmatprep.mubr.f32.mxu1 %v3377_v61  ;;  %2395 = vmatpush1.bf16.msra.mxu0 %v2394_v27  ;;  %v497_v27 = vld [vmem:[%s4991_s3 + $0x1a8] sm:$0xff] }
  0x53   :  { %2397 = vmatprep.subr.bf16.mxu0 %v2396_v28  ;;  %v499_v28 = vld [vmem:[%s4991_s3 + $0x1b8] sm:$0xff] }
  0x54   :  { %279 = vmatmul.mubr.f32.gmra.mrb[4].mxu0 %v3342_v50  ;;  %v471_v50 = vld [vmem:[%s4991_s3 + $0xd8] sm:$0xff]  ;;  %v2440_v30 = vpack.c.bf16 %v499_v28, %v497_v27 }
  0x55   :  { %398 = vmatmul.mubr.f32.gmra.mrb[8].mxu1 %v3390_v2  ;;  %284 = vmatprep.mubr.f32.mxu0 %v3353_v53  ;;  %v2412_v52 = vpack.c.bf16 %v471_v50, %v469_v49  ;;  %v468_v53 = vld [vmem:[%s4991_s3 + $0xc0] sm:$0xff]  ;;  %v182_v49 = vlaneseq  ;;  %v527_v27 = vld [vmem:[%s4991_s3 + $0x298] sm:$0xff] }
  0x56   :  { %403 = vmatprep.mubr.f32.mxu1 %v3401_v5  ;;  %2399 = vmatpush1.bf16.msra.mxu0 %v2398_v33  ;;  %v2414_v57 = vpack.c.bf16 %v470_v54, %v468_v53  ;;  %v501_v33 = vld [vmem:[%s4991_s3 + $0x1c8] sm:$0xff]  ;;  %v2468_v32 = vpack.c.bf16 %v527_v27, %v525_v26  ;;  %v1001_v26 = vld [vmem:[%s4993_s5 + $0x90] sm:$0xff]  ;;  %v1002_v27 = vld [vmem:[%s4993_s5 + $0x98] sm:$0xff] }
  0x57   :  { %2401 = vmatprep.subr.bf16.mxu0 %v2400_v34  ;;  %v503_v34 = vld [vmem:[%s4991_s3 + $0x1d8] sm:$0xff]  ;;  %v3640_v50 = vshrl.u32 %v182_v49, 7 }
  0x58   :  { %285 = vmatmul.mubr.f32.gmra.mrb[6].mxu0 %v3366_v58  ;;  %v2416_v58 = vpack.c.bf16 %v475_v56, %v473_v55  ;;  %v2444_v36 = vpack.c.bf16 %v503_v34, %v501_v33  ;;  %v508_v56 = vld [vmem:[%s4991_s3 + $0x200] sm:$0xff]  ;;  %v526_v34 = vld [vmem:[%s4991_s3 + $0x290] sm:$0xff]  ;;  %v535_v49 = vld [vmem:[%s4991_s3 + $0x2d8] sm:$0xff] }
  0x59   :  { %404 = vmatmul.mubr.f32.gmra.mrb[10].mxu1 %v3414_v10  ;;  %290 = vmatprep.mubr.f32.mxu0 %v3377_v61  ;;  %v477_v61 = vld [vmem:[%s4991_s3 + $0x108] sm:$0xff]  ;;  %v524_v33 = vld [vmem:[%s4991_s3 + $0x280] sm:$0xff] }
  0x5a   :  { %409 = vmatprep.mubr.f32.mxu1 %v3425_v13  ;;  %2403 = vmatpush1.bf16.msra.mxu0 %v2402_v39  ;;  %v2420_v0 = vpack.c.bf16 %v479_v62, %v477_v61  ;;  %v2446_v39 = vpack.c.bf16 %v502_v38, %v500_v37  ;;  %v529_v37 = vld [vmem:[%s4991_s3 + $0x2a8] sm:$0xff]  ;;  %v531_v38 = vld [vmem:[%s4991_s3 + $0x2b8] sm:$0xff] }
  0x5b   :  { %2405 = vmatprep.subr.bf16.mxu0 %v2404_v40  ;;  %v505_v40 = vld [vmem:[%s4991_s3 + $0x1e8] sm:$0xff] }
  0x5c   :  { %291 = vmatmul.mubr.f32.gmra.mrb[8].mxu0 %v3390_v2  ;;  %v478_v2 = vld [vmem:[%s4991_s3 + $0x110] sm:$0xff]  ;;  %v2448_v42 = vpack.c.bf16 %v507_v41, %v505_v40  ;;  %v2470_v41 = vpack.c.bf16 %v526_v34, %v524_v33  ;;  %v986_v33 = vld [vmem:[%s4993_s5 + $0x18] sm:$0xff]  ;;  %v1003_v34 = vld [vmem:[%s4993_s5 + $0xa0] sm:$0xff] }
  0x5d   :  { %410 = vmatmul.mubr.f32.gmra.mrb[12].mxu1 %v3438_v18  ;;  %296 = vmatprep.mubr.f32.mxu0 %v3401_v5  ;;  %v2422_v5 = vpack.c.bf16 %v478_v2, %v476_v1  ;;  %v2456_v1 = vpack.c.bf16 %v515_v60, %v513_v59  ;;  %v512_v2 = vld [vmem:[%s4991_s3 + $0x220] sm:$0xff]  ;;  %v534_v60 = vld [vmem:[%s4991_s3 + $0x2d0] sm:$0xff] }
  0x5e   :  { %2407 = vmatpush1.bf16.msra.mxu0 %v2406_v45  ;;  %v2450_v45 = vpack.c.bf16 %v506_v44, %v504_v43  ;;  %v2472_v43 = vpack.c.bf16 %v531_v38, %v529_v37  ;;  %v528_v44 = vld [vmem:[%s4991_s3 + $0x2a0] sm:$0xff] }
  0x5f   :  { %2409 = vmatprep.subr.bf16.mxu0 %v2408_v46  ;;  %v509_v46 = vld [vmem:[%s4991_s3 + $0x208] sm:$0xff]  ;;  %v532_v59 = vld [vmem:[%s4991_s3 + $0x2c0] sm:$0xff] }
  0x60   :  { %297 = vmatmul.mubr.f32.gmra.mrb[10].mxu0 %v3414_v10  ;;  %v487_v10 = vld [vmem:[%s4991_s3 + $0x158] sm:$0xff]  ;;  %v2452_v48 = vpack.c.bf16 %v511_v47, %v509_v46  ;;  %v544_v38 = vld [vmem:[%s4991_s3 + $0x320] sm:$0xff] }
  0x61   :  { %302 = vmatprep.mubr.f32.mxu0 %v3425_v13  ;;  %v2428_v12 = vpack.c.bf16 %v487_v10, %v485_v9  ;;  %v484_v13 = vld [vmem:[%s4991_s3 + $0x140] sm:$0xff]  ;;  %v2458_v10 = vpack.c.bf16 %v514_v3, %v512_v2 }
  0x62   :  { %2411 = vmatpush1.bf16.msra.mxu0 %v2410_v51  ;;  %v2430_v17 = vpack.c.bf16 %v486_v14, %v484_v13  ;;  %v196_v51 = vsub.s32 3, %v3640_v50  ;;  %v516_v13 = vld [vmem:[%s4991_s3 + $0x240] sm:$0xff]  ;;  %v518_v14 = vld [vmem:[%s4991_s3 + $0x250] sm:$0xff] }
  0x63   :  { %2413 = vmatprep.subr.bf16.mxu0 %v2412_v52  ;;  %v3646_v52 = vld [vmem:[%s4992_s2] sm:$0xf]  ;;  %v2462_v20 = vpack.c.bf16 %v518_v14, %v516_v13  ;;  %v542_v14 = vld [vmem:[%s4991_s3 + $0x310] sm:$0xff] }
  0x64   :  { %303 = vmatmul.mubr.f32.gmra.mrb[12].mxu0 %v3438_v18  ;;  %v2432_v18 = vpack.c.bf16 %v491_v16, %v489_v15  ;;  %v3649_v53 = vrot.slane %v3646_v52, %v196_v51  ;;  %v521_v16 = vld [vmem:[%s4991_s3 + $0x268] sm:$0xff]  ;;  %v540_v13 = vld [vmem:[%s4991_s3 + $0x300] sm:$0xff] }
  0x65   :  { %v2486_v37 = vpack.c.bf16 %v542_v14, %v540_v13 }
  0x66   :  { %2415 = vmatpush1.bf16.msra.mxu0 %v2414_v57  ;;  %v510_v57 = vld [vmem:[%s4991_s3 + $0x210] sm:$0xff] }
  0x67   :  { %2417 = vmatprep.subr.bf16.mxu0 %v2416_v58 }
  0x6a   :  { %2419 = vmatpush1.bf16.msra.mxu0 %v2418_v63  ;;  %v2454_v63 = vpack.c.bf16 %v510_v57, %v508_v56 }
  0x6b   :  { %2421 = vmatprep.subr.bf16.mxu0 %v2420_v0 }
  0x6e   :  { %2423 = vmatpush1.bf16.msra.mxu0 %v2422_v5  ;;  %v517_v5 = vld [vmem:[%s4991_s3 + $0x248] sm:$0xff] }
  0x6f   :  { %2425 = vmatprep.subr.bf16.mxu0 %v2424_v6  ;;  %v519_v6 = vld [vmem:[%s4991_s3 + $0x258] sm:$0xff] }
  0x72   :  { %2427 = vmatpush1.bf16.msra.mxu0 %v2426_v11 }
  0x73   :  { %2429 = vmatprep.subr.bf16.mxu0 %v2428_v12  ;;  %v2460_v12 = vpack.c.bf16 %v519_v6, %v517_v5  ;;  %v538_v6 = vld [vmem:[%s4991_s3 + $0x2f0] sm:$0xff] }
  0x76   :  { %2431 = vmatpush1.bf16.msra.mxu0 %v2430_v17  ;;  %v523_v17 = vld [vmem:[%s4991_s3 + $0x278] sm:$0xff] }
  0x77   :  { %2433 = vmatprep.subr.bf16.mxu0 %v2432_v18  ;;  %v2464_v22 = vpack.c.bf16 %v523_v17, %v521_v16  ;;  %v545_v17 = vld [vmem:[%s4991_s3 + $0x328] sm:$0xff] }
  0x7a   :  { %2435 = vmatpush1.bf16.msra.mxu0 %v2434_v23  ;;  %v520_v23 = vld [vmem:[%s4991_s3 + $0x260] sm:$0xff] }
  0x7b   :  { %2437 = vmatprep.subr.bf16.mxu0 %v2436_v24  ;;  %v522_v24 = vld [vmem:[%s4991_s3 + $0x270] sm:$0xff] }
  0x7e   :  { %2439 = vmatpush1.bf16.msra.mxu0 %v2438_v29 }
  0x7f   :  { %2441 = vmatprep.subr.bf16.mxu0 %v2440_v30  ;;  %v2466_v30 = vpack.c.bf16 %v522_v24, %v520_v23 }
  0x82   :  { %2443 = vmatpush1.bf16.msra.mxu0 %v2442_v35  ;;  %v192_v35 = vsub.s32 2, %v3640_v50 }
  0x83   :  { %2445 = vmatprep.subr.bf16.mxu0 %v2444_v36 }
  0x84   :  { %v3737_v46 = vrot.slane %v3646_v52, %v192_v35 }
  0x86   :  { %2447 = vmatpush1.bf16.msra.mxu0 %v2446_v39 }
  0x87   :  { %2449 = vmatprep.subr.bf16.mxu0 %v2448_v42 }
  0x8a   :  { %2451 = vmatpush1.bf16.msra.mxu0 %v2450_v45  ;;  %v530_v45 = vld [vmem:[%s4991_s3 + $0x2b0] sm:$0xff] }
  0x8b   :  { %2453 = vmatprep.subr.bf16.mxu0 %v2452_v48  ;;  %v533_v48 = vld [vmem:[%s4991_s3 + $0x2c8] sm:$0xff]  ;;  %v2474_v56 = vpack.c.bf16 %v530_v45, %v528_v44  ;;  %v987_v45 = vld [vmem:[%s4993_s5 + $0x20] sm:$0xff] }
 0x118   :  { %v3651_v54 = vpop.f32.mrb[0].mxu1 }
 0x119   :  { %v377_v55 = vpop.f32.mrb[1].mxu1 }
 0x11a   :  { %v378_v58 = vadd.f32 %v377_v55, %v3649_v53 }
 0x11c   :  { %v419_v61 = vmax.f32 %v378_v58, 0.0  ;;  %v3666_v62 = vpop.f32.mrb[2].mxu1  ;;  %v2476_v58 = vpack.c.bf16 %v535_v49, %v533_v48  ;;  %v551_v48 = vld [vmem:[%s4991_s3 + $0x358] sm:$0xff] }
 0x11d   :  { %v383_v0 = vpop.f32.mrb[3].mxu1 }
 0x11e   :  { %v384_v4 = vadd.f32 %v383_v0, %v3649_v53  ;;  %712 = vmatprep.mubr.f32.mxu0 %v419_v61  ;;  %v537_v0 = vld [vmem:[%s4991_s3 + $0x2e8] sm:$0xff] }
 0x11f   :  { %713 = vmatmul.mubr.f32.vlgmr.msra.gmra.mrb[14].mxu0 %v2901_v7  ;;  %v3765_v2 = vpop.f32.mrb[0].mxu0 }
 0x120   :  { %v423_v8 = vmax.f32 %v384_v4, 0.0  ;;  %2455 = vmatpush1.bf16.msra.mxu0 %v2454_v63  ;;  %v3682_v9 = vpop.f32.mrb[4].mxu1  ;;  %v3767_v3 = vpop.f32.mrb[1].mxu0 }
 0x121   :  { %v389_v11 = vpop.f32.mrb[5].mxu1  ;;  %2457 = vmatprep.subr.bf16.mxu0 %v2456_v1  ;;  %v539_v1 = vld [vmem:[%s4991_s3 + $0x2f8] sm:$0xff] }
 0x122   :  { %v390_v15 = vadd.f32 %v389_v11, %v3649_v53  ;;  %718 = vmatprep.mubr.f32.mxu0 %v423_v8  ;;  %v2480_v5 = vpack.c.bf16 %v539_v1, %v537_v0  ;;  %v543_v11 = vld [vmem:[%s4991_s3 + $0x318] sm:$0xff]  ;;  %v553_v1 = vld [vmem:[%s4991_s3 + $0x368] sm:$0xff] }
 0x123   :  { %719 = vmatmul.mubr.f32.gmra.mrb[16].mxu0 %v419_v61  ;;  %v3756_v61 = vadd.f32 %v3651_v54, %v3737_v46  ;;  %v2478_v54 = vpack.c.bf16 %v534_v60, %v532_v59  ;;  %v548_v59 = vld [vmem:[%s4991_s3 + $0x340] sm:$0xff]  ;;  %v550_v60 = vld [vmem:[%s4991_s3 + $0x350] sm:$0xff] }
 0x124   :  { %v427_v18 = vmax.f32 %v390_v15, 0.0  ;;  %2459 = vmatpush1.bf16.msra.mxu0 %v2458_v10  ;;  %v3697_v19 = vpop.f32.mrb[6].mxu1  ;;  %v541_v10 = vld [vmem:[%s4991_s3 + $0x308] sm:$0xff]  ;;  %v2494_v14 = vpack.c.bf16 %v550_v60, %v548_v59  ;;  %v562_v60 = vld [vmem:[%s4991_s3 + $0x3b0] sm:$0xff] }
 0x125   :  { %v395_v21 = vpop.f32.mrb[7].mxu1  ;;  %2461 = vmatprep.subr.bf16.mxu0 %v2460_v12  ;;  %v3782_v12 = vpop.f32.mrb[2].mxu0  ;;  %v2484_v23 = vpack.c.bf16 %v543_v11, %v541_v10  ;;  %v1007_v10 = vld [vmem:[%s4993_s5 + $0xc0] sm:$0xff]  ;;  %v1008_v11 = vld [vmem:[%s4993_s5 + $0xc8] sm:$0xff] }
 0x126   :  { %v396_v25 = vadd.f32 %v395_v21, %v3649_v53  ;;  %724 = vmatprep.mubr.f32.mxu0 %v427_v18  ;;  %v3790_v15 = vpop.f32.mrb[3].mxu0  ;;  %v1000_v21 = vld [vmem:[%s4993_s5 + $0x88] sm:$0xff] }
 0x127   :  { %725 = vmatmul.mubr.f32.gmra.mrb[18].mxu0 %v423_v8  ;;  %v418_v8 = vmax.f32 %v3756_v61, 0.0  ;;  %v589_v61 = vld [vmem:[%s4991_s3 + $0x488] sm:$0xff] }
 0x128   :  { %v431_v28 = vmax.f32 %v396_v25, 0.0  ;;  %2463 = vmatpush1.bf16.msra.mxu0 %v2462_v20  ;;  %v3712_v29 = vpop.f32.mrb[8].mxu1  ;;  %v999_v20 = vld [vmem:[%s4993_s5 + $0x80] sm:$0xff]  ;;  %v984_v25 = vld [vmem:[%s4993_s5 + $0x8] sm:$0xff] }
 0x129   :  { %v401_v31 = vpop.f32.mrb[9].mxu1  ;;  %2465 = vmatprep.subr.bf16.mxu0 %v2464_v22  ;;  %v983_v22 = vld [vmem:[%s4993_s5] sm:$0xff]  ;;  %v2580_v24 = vpack.c.bf16 %v1000_v21, %v999_v20  ;;  %v557_v21 = vld [vmem:[%s4991_s3 + $0x388] sm:$0xff] }
 0x12a   :  { %v402_v36 = vadd.f32 %v401_v31, %v3649_v53  ;;  %730 = vmatprep.mubr.f32.mxu0 %v431_v28  ;;  %v2584_v31 = vpack.c.bf16 %v1002_v27, %v1001_v26  ;;  %v1009_v27 = vld [vmem:[%s4993_s5 + $0xd0] sm:$0xff] }
 0x12b   :  { %731 = vmatmul.mubr.f32.gmra.mrb[20].mxu0 %v427_v18  ;;  %v547_v18 = vld [vmem:[%s4991_s3 + $0x338] sm:$0xff]  ;;  %2581 = vmatprep.subr.bf16.mxu1 %v2580_v24  ;;  %v992_v24 = vld [vmem:[%s4993_s5 + $0x48] sm:$0xff] }
 0x12c   :  { %v435_v39 = vmax.f32 %v402_v36, 0.0  ;;  %2467 = vmatpush1.bf16.msra.mxu0 %v2466_v30  ;;  %v3728_v40 = vpop.f32.mrb[10].mxu1  ;;  %v2582_v30 = vpack.c.bf16 %v984_v25, %v983_v22  ;;  %v1004_v36 = vld [vmem:[%s4993_s5 + $0xa8] sm:$0xff]  ;;  %v2596_v22 = vpack.c.bf16 %v1008_v11, %v1007_v10  ;;  %v559_v25 = vld [vmem:[%s4991_s3 + $0x398] sm:$0xff]  ;;  %v564_v11 = vld [vmem:[%s4991_s3 + $0x3c0] sm:$0xff] }
 0x12d   :  { %v407_v42 = vpop.f32.mrb[11].mxu1  ;;  %2469 = vmatprep.subr.bf16.mxu0 %v2468_v32  ;;  %v985_v32 = vld [vmem:[%s4993_s5 + $0x10] sm:$0xff]  ;;  %v2588_v44 = vpack.c.bf16 %v1004_v36, %v1003_v34 }
 0x12e   :  { %v408_v47 = vadd.f32 %v407_v42, %v3649_v53  ;;  %736 = vmatprep.mubr.f32.mxu0 %v435_v39  ;;  %2583 = vmatpush3.bf16.msra.mxu1 %v2582_v30  ;;  %v2488_v42 = vpack.c.bf16 %v547_v18, %v545_v17  ;;  %v554_v17 = vld [vmem:[%s4991_s3 + $0x370] sm:$0xff]  ;;  %v1010_v30 = vld [vmem:[%s4993_s5 + $0xd8] sm:$0xff] }
 0x12f   :  { %737 = vmatmul.mubr.f32.gmra.mrb[22].mxu0 %v431_v28  ;;  %v3818_v28 = vpop.f32.mrb[4].mxu0  ;;  %2585 = vmatprep.subr.bf16.mxu1 %v2584_v31  ;;  %v558_v34 = vld [vmem:[%s4991_s3 + $0x390] sm:$0xff] }
 0x130   :  { %v439_v51 = vmax.f32 %v408_v47, 0.0  ;;  %2471 = vmatpush1.bf16.msra.mxu0 %v2470_v41  ;;  %v3746_v55 = vpop.f32.mrb[12].mxu1  ;;  %v3829_v35 = vpop.f32.mrb[5].mxu0  ;;  %v2586_v41 = vpack.c.bf16 %v986_v33, %v985_v32  ;;  %v988_v47 = vld [vmem:[%s4993_s5 + $0x28] sm:$0xff]  ;;  %v556_v33 = vld [vmem:[%s4991_s3 + $0x380] sm:$0xff] }
 0x131   :  { %v413_v57 = vpop.f32.mrb[13].mxu1  ;;  %2473 = vmatprep.subr.bf16.mxu0 %v2472_v43  ;;  %v549_v43 = vld [vmem:[%s4991_s3 + $0x348] sm:$0xff]  ;;  %v3852_v49 = vpop.f32.mrb[6].mxu0 }
 0x132   :  { %v414_v63 = vadd.f32 %v413_v57, %v3649_v53  ;;  %742 = vmatprep.mubr.f32.mxu0 %v439_v51  ;;  %v536_v53 = vld [vmem:[%s4991_s3 + $0x2e0] sm:$0xff]  ;;  %v3860_v57 = vpop.f32.mrb[7].mxu0  ;;  %2587 = vmatpush3.bf16.msra.mxu1 %v2586_v41  ;;  %v2492_v0 = vpack.c.bf16 %v551_v48, %v549_v43  ;;  %v993_v41 = vld [vmem:[%s4993_s5 + $0x50] sm:$0xff]  ;;  %v563_v43 = vld [vmem:[%s4991_s3 + $0x3b8] sm:$0xff] }
 0x133   :  { %743 = vmatmul.mubr.f32.gmra.mrb[24].mxu0 %v435_v39  ;;  %v2482_v16 = vpack.c.bf16 %v538_v6, %v536_v53  ;;  %v546_v39 = vld [vmem:[%s4991_s3 + $0x330] sm:$0xff]  ;;  %2589 = vmatprep.subr.bf16.mxu1 %v2588_v44  ;;  %v555_v53 = vld [vmem:[%s4991_s3 + $0x378] sm:$0xff]  ;;  %v3880_v6 = vpop.f32.mrb[8].mxu0 }
 0x134   :  { %v443_v4 = vmax.f32 %v414_v63, 0.0  ;;  %2475 = vmatpush1.bf16.msra.mxu0 %v2474_v56  ;;  %v1006_v56 = vld [vmem:[%s4993_s5 + $0xb8] sm:$0xff]  ;;  %v2590_v63 = vpack.c.bf16 %v988_v47, %v987_v45  ;;  %v3888_v13 = vpop.f32.mrb[9].mxu0  ;;  %v2496_v20 = vpack.c.bf16 %v555_v53, %v553_v1  ;;  %v1011_v45 = vld [vmem:[%s4993_s5 + $0xe0] sm:$0xff]  ;;  %v1012_v47 = vld [vmem:[%s4993_s5 + $0xe8] sm:$0xff] }
 0x135   :  { %2477 = vmatprep.subr.bf16.mxu0 %v2476_v58  ;;  %v2490_v58 = vpack.c.bf16 %v546_v39, %v544_v38  ;;  %v3908_v26 = vpop.f32.mrb[10].mxu0  ;;  %v561_v38 = vld [vmem:[%s4991_s3 + $0x3a8] sm:$0xff]  ;;  %v2600_v39 = vpack.c.bf16 %v1010_v30, %v1009_v27  ;;  %v572_v30 = vld [vmem:[%s4991_s3 + $0x400] sm:$0xff] }
 0x136   :  { %748 = vmatprep.mubr.f32.mxu0 %v443_v4  ;;  %2591 = vmatpush3.bf16.msra.mxu1 %v2590_v63  ;;  %v3916_v31 = vpop.f32.mrb[11].mxu0  ;;  %v2504_v59 = vpack.c.bf16 %v563_v43, %v561_v38  ;;  %v2604_v63 = vpack.c.bf16 %v1012_v47, %v1011_v45  ;;  %v996_v1 = vld [vmem:[%s4993_s5 + $0x68] sm:$0xff]  ;;  %v583_v45 = vld [vmem:[%s4991_s3 + $0x458] sm:$0xff] }
 0x137   :  { %749 = vmatmul.mubr.f32.gmra.mrb[26].mxu0 %v439_v51  ;;  %v1005_v51 = vld [vmem:[%s4993_s5 + $0xb0] sm:$0xff]  ;;  %v3936_v44 = vpop.f32.mrb[12].mxu0  ;;  %v581_v43 = vld [vmem:[%s4991_s3 + $0x448] sm:$0xff] }
 0x138   :  { %2479 = vmatpush1.bf16.msra.mxu0 %v2478_v54  ;;  %819 = vmatprep.mubr.f32.mxu0 %v418_v8  ;;  %v2592_v4 = vpack.c.bf16 %v1006_v56, %v1005_v51  ;;  %v989_v54 = vld [vmem:[%s4993_s5 + $0x30] sm:$0xff]  ;;  %v3944_v48 = vpop.f32.mrb[13].mxu0  ;;  %v2502_v51 = vpack.c.bf16 %v558_v34, %v556_v33  ;;  %v560_v56 = vld [vmem:[%s4991_s3 + $0x3a0] sm:$0xff]  ;;  %v382_v33 = vadd.f32 %v3666_v62, %v3737_v46  ;;  %v577_v34 = vld [vmem:[%s4991_s3 + $0x428] sm:$0xff] }
 0x139   :  { %2481 = vmatprep.subr.bf16.mxu0 %v2480_v5  ;;  %v990_v5 = vld [vmem:[%s4993_s5 + $0x38] sm:$0xff]  ;;  %v578_v62 = vld [vmem:[%s4991_s3 + $0x430] sm:$0xff] }
 0x13a   :  { %v2594_v18 = vpack.c.bf16 %v990_v5, %v989_v54  ;;  %2593 = vmatprep.subr.bf16.mxu1 %v2592_v4  ;;  %v565_v4 = vld [vmem:[%s4991_s3 + $0x3c8] sm:$0xff]  ;;  %v567_v54 = vld [vmem:[%s4991_s3 + $0x3d8] sm:$0xff]  ;;  %v2506_v5 = vpack.c.bf16 %v562_v60, %v560_v56  ;;  %v580_v56 = vld [vmem:[%s4991_s3 + $0x440] sm:$0xff] }
 0x13b   :  { %v2508_v10 = vpack.c.bf16 %v567_v54, %v565_v4  ;;  %v585_v60 = vld [vmem:[%s4991_s3 + $0x468] sm:$0xff]  ;;  %v586_v4 = vld [vmem:[%s4991_s3 + $0x470] sm:$0xff] }
 0x13c   :  { %2483 = vmatpush1.bf16.msra.mxu0 %v2482_v16  ;;  %v552_v16 = vld [vmem:[%s4991_s3 + $0x360] sm:$0xff]  ;;  %2595 = vmatpush3.bf16.msra.mxu1 %v2594_v18 }
 0x13d   :  { %2485 = vmatprep.subr.bf16.mxu0 %v2484_v23  ;;  %v991_v23 = vld [vmem:[%s4993_s5 + $0x40] sm:$0xff]  ;;  %v2498_v32 = vpack.c.bf16 %v554_v17, %v552_v16  ;;  %2597 = vmatprep.subr.bf16.mxu1 %v2596_v22  ;;  %v569_v16 = vld [vmem:[%s4991_s3 + $0x3e8] sm:$0xff]  ;;  %v571_v17 = vld [vmem:[%s4991_s3 + $0x3f8] sm:$0xff] }
 0x13e   :  { %v2598_v36 = vpack.c.bf16 %v992_v24, %v991_v23  ;;  %v570_v22 = vld [vmem:[%s4991_s3 + $0x3f0] sm:$0xff]  ;;  %v573_v23 = vld [vmem:[%s4991_s3 + $0x408] sm:$0xff]  ;;  %v575_v24 = vld [vmem:[%s4991_s3 + $0x418] sm:$0xff] }
 0x13f   :  { %v2516_v27 = vpack.c.bf16 %v575_v24, %v573_v23  ;;  %v594_v24 = vld [vmem:[%s4991_s3 + $0x4b0] sm:$0xff] }
 0x140   :  { %2487 = vmatpush1.bf16.msra.mxu0 %v2486_v37  ;;  %v2500_v37 = vpack.c.bf16 %v559_v25, %v557_v21  ;;  %2599 = vmatpush3.bf16.msra.mxu1 %v2598_v36  ;;  %v568_v21 = vld [vmem:[%s4991_s3 + $0x3e0] sm:$0xff]  ;;  %v579_v36 = vld [vmem:[%s4991_s3 + $0x438] sm:$0xff] }
 0x141   :  { %2489 = vmatprep.subr.bf16.mxu0 %v2488_v42  ;;  %v994_v42 = vld [vmem:[%s4993_s5 + $0x58] sm:$0xff]  ;;  %2601 = vmatprep.subr.bf16.mxu1 %v2600_v39  ;;  %v2514_v25 = vpack.c.bf16 %v570_v22, %v568_v21  ;;  %v2520_v38 = vpack.c.bf16 %v579_v36, %v577_v34  ;;  %v576_v39 = vld [vmem:[%s4991_s3 + $0x420] sm:$0xff] }
 0x142   :  { %v2522_v47 = vpack.c.bf16 %v578_v62, %v576_v39  ;;  %v603_v39 = vld [vmem:[%s4991_s3 + $0x4f8] sm:$0xff] }
 0x144   :  { %2491 = vmatpush1.bf16.msra.mxu0 %v2490_v58  ;;  %v2602_v58 = vpack.c.bf16 %v994_v42, %v993_v41  ;;  %v422_v41 = vmax.f32 %v382_v33, 0.0  ;;  %v388_v42 = vadd.f32 %v3682_v9, %v3737_v46  ;;  %v582_v9 = vld [vmem:[%s4991_s3 + $0x450] sm:$0xff] }
 0x145   :  { %2493 = vmatprep.subr.bf16.mxu0 %v2492_v0  ;;  %v995_v0 = vld [vmem:[%s4993_s5 + $0x60] sm:$0xff] }
 0x146   :  { %2603 = vmatpush3.bf16.msra.mxu1 %v2602_v58  ;;  %v2606_v53 = vpack.c.bf16 %v996_v1, %v995_v0  ;;  %v426_v58 = vmax.f32 %v388_v42, 0.0  ;;  %v2526_v0 = vpack.c.bf16 %v582_v9, %v580_v56  ;;  %v600_v42 = vld [vmem:[%s4991_s3 + $0x4e0] sm:$0xff] }
 0x147   :  { %2605 = vmatprep.subr.bf16.mxu1 %v2604_v63  ;;  %v587_v63 = vld [vmem:[%s4991_s3 + $0x478] sm:$0xff]  ;;  %v604_v9 = vld [vmem:[%s4991_s3 + $0x500] sm:$0xff] }
 0x148   :  { %2495 = vmatpush1.bf16.msra.mxu0 %v2494_v14  ;;  %v566_v14 = vld [vmem:[%s4991_s3 + $0x3d0] sm:$0xff]  ;;  %v2528_v1 = vpack.c.bf16 %v587_v63, %v585_v60  ;;  %v611_v60 = vld [vmem:[%s4991_s3 + $0x538] sm:$0xff] }
 0x149   :  { %2497 = vmatprep.subr.bf16.mxu0 %v2496_v20  ;;  %v2510_v18 = vpack.c.bf16 %v566_v14, %v564_v11  ;;  %v2512_v20 = vpack.c.bf16 %v571_v17, %v569_v16  ;;  %v590_v14 = vld [vmem:[%s4991_s3 + $0x490] sm:$0xff]  ;;  %v406_v17 = vadd.f32 %v3728_v40, %v3737_v46  ;;  %v592_v40 = vld [vmem:[%s4991_s3 + $0x4a0] sm:$0xff] }
 0x14a   :  { %2607 = vmatpush3.bf16.msra.mxu1 %v2606_v53  ;;  %v2538_v33 = vpack.c.bf16 %v594_v24, %v592_v40  ;;  %v620_v24 = vld [vmem:[%s4991_s3 + $0x580] sm:$0xff] }
 0x14c   :  { %2499 = vmatpush1.bf16.msra.mxu0 %v2498_v32  ;;  %v574_v32 = vld [vmem:[%s4991_s3 + $0x410] sm:$0xff] }
 0x14d   :  { %2501 = vmatprep.subr.bf16.mxu0 %v2500_v37  ;;  %v2518_v37 = vpack.c.bf16 %v574_v32, %v572_v30  ;;  %v597_v30 = vld [vmem:[%s4991_s3 + $0x4c8] sm:$0xff]  ;;  %v599_v32 = vld [vmem:[%s4991_s3 + $0x4d8] sm:$0xff] }
 0x14e   :  { %v2540_v36 = vpack.c.bf16 %v599_v32, %v597_v30  ;;  %v627_v30 = vld [vmem:[%s4991_s3 + $0x5b8] sm:$0xff] }
 0x150   :  { %2503 = vmatpush1.bf16.msra.mxu0 %v2502_v51  ;;  %v2524_v51 = vpack.c.bf16 %v583_v45, %v581_v43  ;;  %v602_v43 = vld [vmem:[%s4991_s3 + $0x4f0] sm:$0xff]  ;;  %v605_v45 = vld [vmem:[%s4991_s3 + $0x508] sm:$0xff] }
 0x151   :  { %2505 = vmatprep.subr.bf16.mxu0 %v2504_v59  ;;  %v394_v59 = vadd.f32 %v3697_v19, %v3737_v46  ;;  %v584_v19 = vld [vmem:[%s4991_s3 + $0x460] sm:$0xff] }
 0x152   :  { %v2530_v53 = vpack.c.bf16 %v586_v4, %v584_v19  ;;  %v610_v19 = vld [vmem:[%s4991_s3 + $0x530] sm:$0xff]  ;;  %v613_v4 = vld [vmem:[%s4991_s3 + $0x548] sm:$0xff] }
 0x153   :  { %v430_v54 = vmax.f32 %v394_v59, 0.0  ;;  %v609_v59 = vld [vmem:[%s4991_s3 + $0x528] sm:$0xff] }
 0x154   :  { %2507 = vmatpush1.bf16.msra.mxu0 %v2506_v5  ;;  %v400_v5 = vadd.f32 %v3712_v29, %v3737_v46  ;;  %v588_v29 = vld [vmem:[%s4991_s3 + $0x480] sm:$0xff] }
 0x155   :  { %2509 = vmatprep.subr.bf16.mxu0 %v2508_v10  ;;  %v184_v10 = vsub.s32 0, %v3640_v50  ;;  %v2534_v21 = vpack.c.bf16 %v590_v14, %v588_v29  ;;  %v619_v29 = vld [vmem:[%s4991_s3 + $0x578] sm:$0xff] }
 0x156   :  { %v434_v16 = vmax.f32 %v400_v5, 0.0 }
 0x157   :  { %v4065_v22 = vrot.slane %v3646_v52, %v184_v10 }
 0x158   :  { %2511 = vmatpush1.bf16.msra.mxu0 %v2510_v18  ;;  %v593_v18 = vld [vmem:[%s4991_s3 + $0x4a8] sm:$0xff] }
 0x159   :  { %2513 = vmatprep.subr.bf16.mxu0 %v2512_v20  ;;  %v595_v20 = vld [vmem:[%s4991_s3 + $0x4b8] sm:$0xff]  ;;  %v269_v34 = vadd.f32 %v3765_v2, %v4065_v22 }
 0x15a   :  { %v2536_v23 = vpack.c.bf16 %v595_v20, %v593_v18  ;;  %v618_v18 = vld [vmem:[%s4991_s3 + $0x570] sm:$0xff]  ;;  %v621_v20 = vld [vmem:[%s4991_s3 + $0x588] sm:$0xff] }
 0x15b   :  { %v416_v62 = vmax.f32 %v269_v34, 0.0  ;;  %v624_v34 = vld [vmem:[%s4991_s3 + $0x5a0] sm:$0xff] }
 0x15c   :  { %2515 = vmatpush1.bf16.msra.mxu0 %v2514_v25  ;;  %v438_v25 = vmax.f32 %v406_v17, 0.0  ;;  %v616_v17 = vld [vmem:[%s4991_s3 + $0x560] sm:$0xff] }
 0x15d   :  { %2517 = vmatprep.subr.bf16.mxu0 %v2516_v27  ;;  %v412_v27 = vadd.f32 %v3746_v55, %v3737_v46  ;;  %v596_v46 = vld [vmem:[%s4991_s3 + $0x4c0] sm:$0xff]  ;;  %v598_v55 = vld [vmem:[%s4991_s3 + $0x4d0] sm:$0xff] }
 0x15e   :  { %v2542_v2 = vpack.c.bf16 %v598_v55, %v596_v46  ;;  %v629_v46 = vld [vmem:[%s4991_s3 + $0x5c8] sm:$0xff]  ;;  %v631_v55 = vld [vmem:[%s4991_s3 + $0x5d8] sm:$0xff] }
 0x15f   :  { %820 = vmatmul.mubr.f32.vlgmr.msra.gmra.mrb[14].mxu0 %v2901_v7 }
 0x160   :  { %825 = vmatprep.mubr.f32.mxu0 %v422_v41  ;;  %2519 = vmatpush1.bf16.msra.mxu0 %v2518_v37  ;;  %v442_v37 = vmax.f32 %v412_v27, 0.0  ;;  %v625_v27 = vld [vmem:[%s4991_s3 + $0x5a8] sm:$0xff] }
 0x161   :  { %2521 = vmatprep.subr.bf16.mxu0 %v2520_v38  ;;  %v601_v38 = vld [vmem:[%s4991_s3 + $0x4e8] sm:$0xff] }
 0x163   :  { %826 = vmatmul.mubr.f32.gmra.mrb[16].mxu0 %v418_v8  ;;  %v591_v8 = vld [vmem:[%s4991_s3 + $0x498] sm:$0xff] }
 0x164   :  { %831 = vmatprep.mubr.f32.mxu0 %v426_v58  ;;  %2523 = vmatpush1.bf16.msra.mxu0 %v2522_v47  ;;  %v2532_v11 = vpack.c.bf16 %v591_v8, %v589_v61  ;;  %v607_v47 = vld [vmem:[%s4991_s3 + $0x518] sm:$0xff]  ;;  %v612_v8 = vld [vmem:[%s4991_s3 + $0x540] sm:$0xff] }
 0x165   :  { %2525 = vmatprep.subr.bf16.mxu0 %v2524_v51  ;;  %v2546_v51 = vpack.c.bf16 %v602_v43, %v600_v42  ;;  %v2548_v56 = vpack.c.bf16 %v607_v47, %v605_v45  ;;  %v635_v42 = vld [vmem:[%s4991_s3 + $0x5f8] sm:$0xff] }
 0x167   :  { %832 = vmatmul.mubr.f32.gmra.mrb[18].mxu0 %v422_v41  ;;  %v2544_v41 = vpack.c.bf16 %v603_v39, %v601_v38  ;;  %v2572_v39 = vpack.c.bf16 %v631_v55, %v629_v46  ;;  %v1195_v55 = vld [vmem:[%s4993_s5 + $0x6a0] sm:$0xff] }
 0x168   :  { %837 = vmatprep.mubr.f32.mxu0 %v430_v54  ;;  %2527 = vmatpush1.bf16.msra.mxu0 %v2526_v0  ;;  %v2552_v0 = vpack.c.bf16 %v611_v60, %v609_v59  ;;  %v275_v60 = vadd.f32 %v3782_v12, %v4065_v22  ;;  %v287_v12 = vadd.f32 %v3852_v49, %v4065_v22 }
 0x169   :  { %2529 = vmatprep.subr.bf16.mxu0 %v2528_v1  ;;  %v608_v1 = vld [vmem:[%s4991_s3 + $0x520] sm:$0xff] }
 0x16a   :  { %v2554_v5 = vpack.c.bf16 %v610_v19, %v608_v1  ;;  %v420_v19 = vmax.f32 %v275_v60, 0.0 }
 0x16b   :  { %838 = vmatmul.mubr.f32.gmra.mrb[20].mxu0 %v426_v58  ;;  %v606_v58 = vld [vmem:[%s4991_s3 + $0x510] sm:$0xff] }
 0x16c   :  { %843 = vmatprep.mubr.f32.mxu0 %v434_v16  ;;  %2531 = vmatpush1.bf16.msra.mxu0 %v2530_v53  ;;  %v2550_v63 = vpack.c.bf16 %v606_v58, %v604_v9  ;;  %v614_v53 = vld [vmem:[%s4991_s3 + $0x550] sm:$0xff]  ;;  %v1191_v9 = vld [vmem:[%s4993_s5 + $0x680] sm:$0xff] }
 0x16d   :  { %2533 = vmatprep.subr.bf16.mxu0 %v2532_v11  ;;  %v617_v11 = vld [vmem:[%s4991_s3 + $0x568] sm:$0xff]  ;;  %v2558_v14 = vpack.c.bf16 %v614_v53, %v612_v8  ;;  %v293_v53 = vadd.f32 %v3880_v6, %v4065_v22 }
 0x16f   :  { %844 = vmatmul.mubr.f32.gmra.mrb[22].mxu0 %v430_v54  ;;  %v615_v54 = vld [vmem:[%s4991_s3 + $0x558] sm:$0xff] }
 0x170   :  { %849 = vmatprep.mubr.f32.mxu0 %v438_v25  ;;  %2535 = vmatpush1.bf16.msra.mxu0 %v2534_v21  ;;  %v2556_v61 = vpack.c.bf16 %v615_v54, %v613_v4  ;;  %v623_v21 = vld [vmem:[%s4991_s3 + $0x598] sm:$0xff]  ;;  %v281_v4 = vadd.f32 %v3818_v28, %v4065_v22 }
 0x171   :  { %2537 = vmatprep.subr.bf16.mxu0 %v2536_v23  ;;  %v2562_v23 = vpack.c.bf16 %v618_v18, %v616_v17  ;;  %v2564_v40 = vpack.c.bf16 %v623_v21, %v621_v20  ;;  %v997_v21 = vld [vmem:[%s4993_s5 + $0x70] sm:$0xff] }
 0x173   :  { %850 = vmatmul.mubr.f32.gmra.mrb[24].mxu0 %v434_v16  ;;  %v2560_v16 = vpack.c.bf16 %v619_v29, %v617_v11  ;;  %v432_v29 = vmax.f32 %v293_v53, 0.0 }
 0x174   :  { %855 = vmatprep.mubr.f32.mxu0 %v442_v37  ;;  %2539 = vmatpush1.bf16.msra.mxu0 %v2538_v33  ;;  %v2568_v33 = vpack.c.bf16 %v627_v30, %v625_v27  ;;  %v188_v37 = vsub.s32 1, %v3640_v50  ;;  %v1177_v27 = vld [vmem:[%s4993_s5 + $0x610] sm:$0xff]  ;;  %v1178_v30 = vld [vmem:[%s4993_s5 + $0x618] sm:$0xff] }
 0x175   :  { %2541 = vmatprep.subr.bf16.mxu0 %v2540_v36  ;;  %v626_v36 = vld [vmem:[%s4991_s3 + $0x5b0] sm:$0xff] }
 0x176   :  { %v2570_v38 = vpack.c.bf16 %v626_v36, %v624_v34  ;;  %v189_v43 = vrot.slane %v3646_v52, %v188_v37  ;;  %v1192_v52 = vld [vmem:[%s4993_s5 + $0x688] sm:$0xff]  ;;  %v1031_v34 = vld [vmem:[%s4993_s5 + $0x180] sm:$0xff]  ;;  %v1033_v50 = vld [vmem:[%s4993_s5 + $0x190] sm:$0xff] }
 0x177   :  { %856 = vmatmul.mubr.f32.gmra.mrb[26].mxu0 %v438_v25  ;;  %v622_v25 = vld [vmem:[%s4991_s3 + $0x590] sm:$0xff]  ;;  %v1032_v36 = vld [vmem:[%s4993_s5 + $0x188] sm:$0xff] }
 0x178   :  { %2543 = vmatpush1.bf16.msra.mxu0 %v2542_v2  ;;  %926 = vmatprep.mubr.f32.mxu0 %v416_v62  ;;  %v2566_v32 = vpack.c.bf16 %v622_v25, %v620_v24  ;;  %v628_v2 = vld [vmem:[%s4991_s3 + $0x5c0] sm:$0xff]  ;;  %v630_v62 = vld [vmem:[%s4991_s3 + $0x5d0] sm:$0xff]  ;;  %v271_v58 = vadd.f32 %v3767_v3, %v189_v43  ;;  %v277_v1 = vadd.f32 %v3790_v15, %v189_v43  ;;  %v428_v15 = vmax.f32 %v287_v12, 0.0  ;;  %v1194_v25 = vld [vmem:[%s4993_s5 + $0x698] sm:$0xff] }
 0x179   :  { %2545 = vmatprep.subr.bf16.mxu0 %v2544_v41  ;;  %v633_v41 = vld [vmem:[%s4991_s3 + $0x5e8] sm:$0xff]  ;;  %v2574_v45 = vpack.c.bf16 %v630_v62, %v628_v2  ;;  %v283_v3 = vadd.f32 %v3829_v35, %v189_v43  ;;  %v289_v8 = vadd.f32 %v3860_v57, %v189_v43  ;;  %v295_v11 = vadd.f32 %v3888_v13, %v189_v43  ;;  %v1179_v2 = vld [vmem:[%s4993_s5 + $0x620] sm:$0xff] }
 0x17a   :  { %v2576_v47 = vpack.c.bf16 %v635_v42, %v633_v41  ;;  %v421_v54 = vmax.f32 %v277_v1, 0.0  ;;  %v299_v35 = vadd.f32 %v3908_v26, %v4065_v22  ;;  %v301_v49 = vadd.f32 %v3916_v31, %v189_v43  ;;  %v1175_v26 = vld [vmem:[%s4993_s5 + $0x600] sm:$0xff]  ;;  %v1176_v31 = vld [vmem:[%s4993_s5 + $0x608] sm:$0xff]  ;;  %v1197_v42 = vld [vmem:[%s4993_s5 + $0x6b0] sm:$0xff] }
 0x17b   :  { %v429_v28 = vmax.f32 %v289_v8, 0.0  ;;  %v305_v57 = vadd.f32 %v3936_v44, %v4065_v22  ;;  %v307_v6 = vadd.f32 %v3944_v48, %v189_v43  ;;  %v2774_v20 = vpack.c.bf16 %v1176_v31, %v1175_v26  ;;  %v1013_v44 = vld [vmem:[%s4993_s5 + $0xf0] sm:$0xff]  ;;  %v1014_v48 = vld [vmem:[%s4993_s5 + $0xf8] sm:$0xff]  ;;  %v1180_v62 = vld [vmem:[%s4993_s5 + $0x628] sm:$0xff] }
 0x17c   :  { %2547 = vmatpush1.bf16.msra.mxu0 %v2546_v51  ;;  %v632_v51 = vld [vmem:[%s4991_s3 + $0x5e0] sm:$0xff]  ;;  %v437_v17 = vmax.f32 %v301_v49, 0.0  ;;  %v2608_v22 = vpack.c.bf16 %v1014_v48, %v1013_v44  ;;  %v2612_v46 = vpack.c.bf16 %v1032_v36, %v1031_v34  ;;  %v2782_v41 = vpack.c.bf16 %v1180_v62, %v1179_v2  ;;  %v1198_v43 = vld [vmem:[%s4993_s5 + $0x6b8] sm:$0xff]  ;;  %v1204_v12 = vld [vmem:[%s4993_s5 + $0x6e8] sm:$0xff] }
 0x17d   :  { %2549 = vmatprep.subr.bf16.mxu0 %v2548_v56  ;;  %v634_v56 = vld [vmem:[%s4991_s3 + $0x5f0] sm:$0xff]  ;;  %v440_v18 = vmax.f32 %v305_v57, 0.0  ;;  %v441_v13 = vmax.f32 %v307_v6, 0.0  ;;  %v1202_v1 = vld [vmem:[%s4993_s5 + $0x6d8] sm:$0xff]  ;;  %v1188_v8 = vld [vmem:[%s4993_s5 + $0x668] sm:$0xff] }
 0x17e   :  { %v2578_v59 = vpack.c.bf16 %v634_v56, %v632_v51  ;;  %2609 = vmatprep.subr.bf16.mxu1 %v2608_v22  ;;  %v2784_v51 = vpack.c.bf16 %v1198_v43, %v1197_v42  ;;  %v1015_v26 = vld [vmem:[%s4993_s5 + $0x100] sm:$0xff]  ;;  %v1016_v31 = vld [vmem:[%s4993_s5 + $0x108] sm:$0xff]  ;;  %v1037_v62 = vld [vmem:[%s4993_s5 + $0x1b0] sm:$0xff] }
 0x17f   :  { %v2614_v48 = vpack.c.bf16 %v1016_v31, %v1015_v26  ;;  %v1020_v2 = vld [vmem:[%s4993_s5 + $0x128] sm:$0xff]  ;;  %v1027_v31 = vld [vmem:[%s4993_s5 + $0x160] sm:$0xff] }
 0x180   :  { %2551 = vmatpush1.bf16.msra.mxu0 %v2550_v63  ;;  %v2772_v63 = vpack.c.bf16 %v1192_v52, %v1191_v9  ;;  %v1199_v9 = vld [vmem:[%s4993_s5 + $0x6c0] sm:$0xff]  ;;  %v1200_v52 = vld [vmem:[%s4993_s5 + $0x6c8] sm:$0xff] }
 0x181   :  { %2553 = vmatprep.subr.bf16.mxu0 %v2552_v0  ;;  %v417_v0 = vmax.f32 %v271_v58, 0.0  ;;  %v1183_v58 = vld [vmem:[%s4993_s5 + $0x640] sm:$0xff]  ;;  %v2788_v60 = vpack.c.bf16 %v1200_v52, %v1199_v9  ;;  %v1022_v9 = vld [vmem:[%s4993_s5 + $0x138] sm:$0xff] }
 0x184   :  { %2555 = vmatpush1.bf16.msra.mxu0 %v2554_v5  ;;  %v424_v5 = vmax.f32 %v281_v4, 0.0  ;;  %v1186_v4 = vld [vmem:[%s4993_s5 + $0x658] sm:$0xff] }
 0x185   :  { %2557 = vmatprep.subr.bf16.mxu0 %v2556_v61  ;;  %v425_v61 = vmax.f32 %v283_v3, 0.0 }
 0x188   :  { %2559 = vmatpush1.bf16.msra.mxu0 %v2558_v14  ;;  %v433_v14 = vmax.f32 %v295_v11, 0.0  ;;  %v1206_v11 = vld [vmem:[%s4993_s5 + $0x6f8] sm:$0xff] }
 0x189   :  { %2561 = vmatprep.subr.bf16.mxu0 %v2560_v16  ;;  %v436_v16 = vmax.f32 %v299_v35, 0.0  ;;  %v1190_v35 = vld [vmem:[%s4993_s5 + $0x678] sm:$0xff] }
 0x18c   :  { %2563 = vmatpush1.bf16.msra.mxu0 %v2562_v23  ;;  %v998_v23 = vld [vmem:[%s4993_s5 + $0x78] sm:$0xff] }
 0x18d   :  { %2565 = vmatprep.subr.bf16.mxu0 %v2564_v40  ;;  %v1193_v40 = vld [vmem:[%s4993_s5 + $0x690] sm:$0xff]  ;;  %v2610_v24 = vpack.c.bf16 %v998_v23, %v997_v21 }
 0x18f   :  { %2611 = vmatpush3.bf16.msra.mxu1 %v2610_v24  ;;  %v1017_v24 = vld [vmem:[%s4993_s5 + $0x110] sm:$0xff] }
 0x190   :  { %2567 = vmatpush1.bf16.msra.mxu0 %v2566_v32  ;;  %v2776_v32 = vpack.c.bf16 %v1194_v25, %v1193_v40  ;;  %2613 = vmatprep.subr.bf16.mxu1 %v2612_v46  ;;  %v1018_v25 = vld [vmem:[%s4993_s5 + $0x118] sm:$0xff] }
 0x191   :  { %2569 = vmatprep.subr.bf16.mxu0 %v2568_v33  ;;  %v2778_v33 = vpack.c.bf16 %v1178_v30, %v1177_v27  ;;  %v1035_v30 = vld [vmem:[%s4993_s5 + $0x1a0] sm:$0xff]  ;;  %v2618_v36 = vpack.c.bf16 %v1018_v25, %v1017_v24  ;;  %v1064_v25 = vld [vmem:[%s4993_s5 + $0x288] sm:$0xff] }
 0x192   :  { %v1063_v24 = vld [vmem:[%s4993_s5 + $0x280] sm:$0xff] }
 0x194   :  { %2571 = vmatpush1.bf16.msra.mxu0 %v2570_v38  ;;  %v1196_v38 = vld [vmem:[%s4993_s5 + $0x6a8] sm:$0xff] }
 0x195   :  { %2573 = vmatprep.subr.bf16.mxu0 %v2572_v39  ;;  %v2780_v39 = vpack.c.bf16 %v1196_v38, %v1195_v55 }
 0x198   :  { %2575 = vmatpush1.bf16.msra.mxu0 %v2574_v45  ;;  %v1181_v45 = vld [vmem:[%s4993_s5 + $0x630] sm:$0xff] }
 0x199   :  { %2577 = vmatprep.subr.bf16.mxu0 %v2576_v47  ;;  %v1182_v47 = vld [vmem:[%s4993_s5 + $0x638] sm:$0xff] }
 0x19a   :  { %v2786_v56 = vpack.c.bf16 %v1182_v47, %v1181_v45 }
 0x19c   :  { %2579 = vmatpush1.bf16.msra.mxu0 %v2578_v59  ;;  %v1184_v59 = vld [vmem:[%s4993_s5 + $0x648] sm:$0xff] }
 0x19d   :  { %2773 = vmatprep.subr.bf16.mxu0 %v2772_v63  ;;  %v2790_v63 = vpack.c.bf16 %v1184_v59, %v1183_v58  ;;  %v1039_v58 = vld [vmem:[%s4993_s5 + $0x1c0] sm:$0xff]  ;;  %v1040_v59 = vld [vmem:[%s4993_s5 + $0x1c8] sm:$0xff] }
 0x19f   :  { %927 = vmatmul.mubr.f32.vlgmr.msra.gmra.mrb[14].mxu0 %v417_v0  ;;  %v1201_v0 = vld [vmem:[%s4993_s5 + $0x6d0] sm:$0xff] }
 0x1a0   :  { %932 = vmatprep.mubr.f32.mxu0 %v420_v19  ;;  %2775 = vmatpush3.bf16.msra.mxu0 %v2774_v20  ;;  %v1185_v19 = vld [vmem:[%s4993_s5 + $0x650] sm:$0xff] }
 0x1a1   :  { %2777 = vmatprep.subr.bf16.mxu0 %v2776_v32  ;;  %v2794_v3 = vpack.c.bf16 %v1186_v4, %v1185_v19  ;;  %v1036_v32 = vld [vmem:[%s4993_s5 + $0x1a8] sm:$0xff]  ;;  %v2628_v19 = vpack.c.bf16 %v1040_v59, %v1039_v58  ;;  %v1023_v4 = vld [vmem:[%s4993_s5 + $0x140] sm:$0xff]  ;;  %v1070_v58 = vld [vmem:[%s4993_s5 + $0x2b8] sm:$0xff] }
 0x1a2   :  { %v2620_v38 = vpack.c.bf16 %v1036_v32, %v1035_v30  ;;  %v2644_v30 = vpack.c.bf16 %v1064_v25, %v1063_v24  ;;  %v1047_v32 = vld [vmem:[%s4993_s5 + $0x200] sm:$0xff]  ;;  %v1080_v24 = vld [vmem:[%s4993_s5 + $0x308] sm:$0xff]  ;;  %v1097_v25 = vld [vmem:[%s4993_s5 + $0x390] sm:$0xff] }
 0x1a3   :  { %933 = vmatmul.mubr.f32.gmra.mrb[16].mxu0 %v421_v54  ;;  %v2792_v54 = vpack.c.bf16 %v1202_v1, %v1201_v0 }
 0x1a4   :  { %938 = vmatprep.mubr.f32.mxu0 %v424_v5  ;;  %2779 = vmatpush3.bf16.msra.mxu0 %v2778_v33  ;;  %v1203_v5 = vld [vmem:[%s4993_s5 + $0x6e0] sm:$0xff] }
 0x1a5   :  { %2781 = vmatprep.subr.bf16.mxu0 %v2780_v39  ;;  %v1019_v39 = vld [vmem:[%s4993_s5 + $0x120] sm:$0xff] }
 0x1a6   :  { %v2622_v43 = vpack.c.bf16 %v1020_v2, %v1019_v39 }
 0x1a7   :  { %939 = vmatmul.mubr.f32.gmra.mrb[18].mxu0 %v425_v61  ;;  %v1187_v61 = vld [vmem:[%s4993_s5 + $0x660] sm:$0xff] }
 0x1a8   :  { %944 = vmatprep.mubr.f32.mxu0 %v428_v15  ;;  %2783 = vmatpush3.bf16.msra.mxu0 %v2782_v41  ;;  %v2796_v15 = vpack.c.bf16 %v1204_v12, %v1203_v5  ;;  %v2798_v53 = vpack.c.bf16 %v1188_v8, %v1187_v61  ;;  %v1038_v41 = vld [vmem:[%s4993_s5 + $0x1b8] sm:$0xff]  ;;  %v1041_v5 = vld [vmem:[%s4993_s5 + $0x1d0] sm:$0xff] }
 0x1a9   :  { %2785 = vmatprep.subr.bf16.mxu0 %v2784_v51  ;;  %v2624_v51 = vpack.c.bf16 %v1038_v41, %v1037_v62  ;;  %v1042_v12 = vld [vmem:[%s4993_s5 + $0x1d8] sm:$0xff]  ;;  %v1049_v41 = vld [vmem:[%s4993_s5 + $0x210] sm:$0xff] }
 0x1ab   :  { %945 = vmatmul.mubr.f32.gmra.mrb[20].mxu0 %v429_v28  ;;  %v1205_v28 = vld [vmem:[%s4993_s5 + $0x6f0] sm:$0xff] }
 0x1ac   :  { %950 = vmatprep.mubr.f32.mxu0 %v432_v29  ;;  %2787 = vmatpush3.bf16.msra.mxu0 %v2786_v56  ;;  %v1189_v29 = vld [vmem:[%s4993_s5 + $0x670] sm:$0xff] }
 0x1ad   :  { %2789 = vmatprep.subr.bf16.mxu0 %v2788_v60  ;;  %v2802_v49 = vpack.c.bf16 %v1190_v35, %v1189_v29  ;;  %v1021_v56 = vld [vmem:[%s4993_s5 + $0x130] sm:$0xff]  ;;  %v1026_v29 = vld [vmem:[%s4993_s5 + $0x158] sm:$0xff] }
 0x1af   :  { %951 = vmatmul.mubr.f32.gmra.mrb[22].mxu0 %v433_v14  ;;  %v2800_v14 = vpack.c.bf16 %v1206_v11, %v1205_v28  ;;  %v2632_v28 = vpack.c.bf16 %v1042_v12, %v1041_v5  ;;  %v1025_v11 = vld [vmem:[%s4993_s5 + $0x150] sm:$0xff]  ;;  %v1055_v12 = vld [vmem:[%s4993_s5 + $0x240] sm:$0xff] }
 0x1b0   :  { %956 = vmatprep.mubr.f32.mxu0 %v436_v16  ;;  %2791 = vmatpush3.bf16.msra.mxu0 %v2790_v63  ;;  %v636_v16 = vld [vmem:[%s4994_s4] sm:$0x3]  ;;  %v2626_v63 = vpack.c.bf16 %v1022_v9, %v1021_v56  ;;  %v1052_v56 = vld [vmem:[%s4993_s5 + $0x228] sm:$0xff]  ;;  %v1069_v9 = vld [vmem:[%s4993_s5 + $0x2b0] sm:$0xff] }
 0x1b1   :  { %2793 = vmatprep.subr.bf16.mxu0 %v2792_v54  ;;  %v4339_v57 = vrot.slane %v636_v16, %v184_v10  ;;  %v1034_v10 = vld [vmem:[%s4993_s5 + $0x198] sm:$0xff]  ;;  %v1024_v54 = vld [vmem:[%s4993_s5 + $0x148] sm:$0xff] }
 0x1b2   :  { %v2616_v40 = vpack.c.bf16 %v1034_v10, %v1033_v50  ;;  %v2630_v8 = vpack.c.bf16 %v1024_v54, %v1023_v4  ;;  %v1045_v10 = vld [vmem:[%s4993_s5 + $0x1f0] sm:$0xff]  ;;  %v1072_v4 = vld [vmem:[%s4993_s5 + $0x2c8] sm:$0xff] }
 0x1b3   :  { %957 = vmatmul.mubr.f32.gmra.mrb[24].mxu0 %v437_v17  ;;  %v4343_v17 = vrot.slane %v636_v16, %v188_v37 }
 0x1b4   :  { %962 = vmatprep.mubr.f32.mxu0 %v440_v18  ;;  %2795 = vmatpush3.bf16.msra.mxu0 %v2794_v3 }
 0x1b5   :  { %2797 = vmatprep.subr.bf16.mxu0 %v2796_v15 }
 0x1b7   :  { %963 = vmatmul.mubr.f32.gmra.mrb[26].mxu0 %v441_v13 }
 0x1b8   :  { %2799 = vmatpush3.bf16.msra.mxu0 %v2798_v53 }
 0x1b9   :  { %2801 = vmatprep.subr.bf16.mxu0 %v2800_v14  ;;  %v1043_v14 = vld [vmem:[%s4993_s5 + $0x1e0] sm:$0xff] }
 0x1bc   :  { %2803 = vmatpush3.bf16.msra.mxu0 %v2802_v49  ;;  %v1044_v49 = vld [vmem:[%s4993_s5 + $0x1e8] sm:$0xff] }
 0x1bd   :  { %v2636_v26 = vpack.c.bf16 %v1044_v49, %v1043_v14  ;;  %v1058_v14 = vld [vmem:[%s4993_s5 + $0x258] sm:$0xff]  ;;  %v1075_v49 = vld [vmem:[%s4993_s5 + $0x2e0] sm:$0xff] }
 0x272   :  { %v928_v6 = vpop.f32.mrb[14].mxu0 }
 0x273   :  { %v2852_v18 = vadd.f32 %v928_v6, %v4339_v57  ;;  %v930_v13 = vpop.f32.mrb[15].mxu0  ;;  %v2634_v6 = vpack.c.bf16 %v1026_v29, %v1025_v11  ;;  %v1057_v29 = vld [vmem:[%s4993_s5 + $0x250] sm:$0xff] }
 0x274   :  { %v2853_v20 = vadd.f32 %v930_v13, %v4343_v17 }
 0x275   :  { %v969_v22 = vmax.f32 %v2852_v18, 0.0 }
 0x276   :  { %v970_v37 = vmax.f32 %v2853_v20, 0.0  ;;  %v934_v44 = vpop.f32.mrb[16].mxu0  ;;  %v1028_v20 = vld [vmem:[%s4993_s5 + $0x168] sm:$0xff] }
 0x277   :  { %v4360_v21 = vadd.f32 %v934_v44, %v4339_v57  ;;  %v936_v23 = vpop.f32.mrb[17].mxu0  ;;  %v2638_v44 = vpack.c.bf16 %v1028_v20, %v1027_v31  ;;  %v1077_v31 = vld [vmem:[%s4993_s5 + $0x2f0] sm:$0xff]  ;;  %v1078_v20 = vld [vmem:[%s4993_s5 + $0x2f8] sm:$0xff] }
 0x278   :  { %v2855_v27 = vadd.f32 %v936_v23, %v4343_v17  ;;  %1278 = vmatprep.mubr.f32.mxu1 %v970_v37  ;;  %v1029_v23 = vld [vmem:[%s4993_s5 + $0x170] sm:$0xff] }
 0x279   :  { %1279 = vmatmul.mubr.f32.vlgmr.msra.gmra.mrb[14].mxu1 %v969_v22  ;;  %v971_v2 = vmax.f32 %v4360_v21, 0.0 }
 0x27a   :  { %v972_v33 = vmax.f32 %v2855_v27, 0.0  ;;  %2615 = vmatpush3.bf16.msra.mxu1 %v2614_v48  ;;  %v940_v34 = vpop.f32.mrb[18].mxu0 }
 0x27b   :  { %v4376_v46 = vadd.f32 %v940_v34, %v4339_v57  ;;  %v4378_v55 = vpop.f32.mrb[19].mxu0  ;;  %2617 = vmatprep.subr.bf16.mxu1 %v2616_v40  ;;  %v1030_v40 = vld [vmem:[%s4993_s5 + $0x178] sm:$0xff] }
 0x27c   :  { %1348 = vmatprep.mubr.f32.mxu1 %v972_v33  ;;  %v2642_v27 = vpack.c.bf16 %v1030_v40, %v1029_v23  ;;  %v1048_v33 = vld [vmem:[%s4993_s5 + $0x208] sm:$0xff]  ;;  %v2857_v34 = vadd.f32 %v4378_v55, %v4343_v17  ;;  %v1079_v40 = vld [vmem:[%s4993_s5 + $0x300] sm:$0xff] }
 0x27d   :  { %v2646_v39 = vpack.c.bf16 %v1048_v33, %v1047_v32  ;;  %v973_v32 = vmax.f32 %v4376_v46, 0.0  ;;  %v1100_v46 = vld [vmem:[%s4993_s5 + $0x3a8] sm:$0xff] }
 0x27e   :  { %2619 = vmatpush3.bf16.msra.mxu1 %v2618_v36  ;;  %v946_v42 = vpop.f32.mrb[20].mxu0  ;;  %v1065_v36 = vld [vmem:[%s4993_s5 + $0x290] sm:$0xff]  ;;  %v974_v55 = vmax.f32 %v2857_v34, 0.0 }
 0x27f   :  { %v4393_v45 = vadd.f32 %v946_v42, %v4339_v57  ;;  %v948_v47 = vpop.f32.mrb[21].mxu0  ;;  %2621 = vmatprep.subr.bf16.mxu1 %v2620_v38  ;;  %v1066_v38 = vld [vmem:[%s4993_s5 + $0x298] sm:$0xff]  ;;  %v1067_v42 = vld [vmem:[%s4993_s5 + $0x2a0] sm:$0xff]  ;;  %v1081_v34 = vld [vmem:[%s4993_s5 + $0x310] sm:$0xff] }
 0x280   :  { %v4402_v52 = vadd.f32 %v948_v47, %v4343_v17  ;;  %v2648_v62 = vpack.c.bf16 %v1066_v38, %v1065_v36  ;;  %v1082_v36 = vld [vmem:[%s4993_s5 + $0x318] sm:$0xff] }
 0x282   :  { %2623 = vmatpush3.bf16.msra.mxu1 %v2622_v43  ;;  %v952_v60 = vpop.f32.mrb[22].mxu0  ;;  %v1068_v43 = vld [vmem:[%s4993_s5 + $0x2a8] sm:$0xff]  ;;  %v976_v38 = vmax.f32 %v4402_v52, 0.0 }
 0x283   :  { %v4411_v0 = vadd.f32 %v952_v60, %v4339_v57  ;;  %v954_v1 = vpop.f32.mrb[23].mxu0  ;;  %2625 = vmatprep.subr.bf16.mxu1 %v2624_v51  ;;  %v2652_v47 = vpack.c.bf16 %v1068_v43, %v1067_v42  ;;  %v1051_v51 = vld [vmem:[%s4993_s5 + $0x220] sm:$0xff]  ;;  %v2656_v60 = vpack.c.bf16 %v1070_v58, %v1069_v9  ;;  %v1084_v52 = vld [vmem:[%s4993_s5 + $0x328] sm:$0xff] }
 0x284   :  { %v4420_v3 = vadd.f32 %v954_v1, %v4343_v17  ;;  %v2654_v59 = vpack.c.bf16 %v1052_v56, %v1051_v51  ;;  %v1054_v1 = vld [vmem:[%s4993_s5 + $0x238] sm:$0xff]  ;;  %v1103_v51 = vld [vmem:[%s4993_s5 + $0x3c0] sm:$0xff]  ;;  %v1104_v56 = vld [vmem:[%s4993_s5 + $0x3c8] sm:$0xff] }
 0x285   :  { %v2692_v58 = vpack.c.bf16 %v1104_v56, %v1103_v51  ;;  %v1121_v51 = vld [vmem:[%s4993_s5 + $0x450] sm:$0xff]  ;;  %v1122_v56 = vld [vmem:[%s4993_s5 + $0x458] sm:$0xff] }
 0x286   :  { %2627 = vmatpush3.bf16.msra.mxu1 %v2626_v63  ;;  %v958_v61 = vpop.f32.mrb[24].mxu0  ;;  %v1053_v63 = vld [vmem:[%s4993_s5 + $0x230] sm:$0xff] }
 0x287   :  { %v4429_v15 = vadd.f32 %v958_v61, %v4339_v57  ;;  %v960_v53 = vpop.f32.mrb[25].mxu0  ;;  %2629 = vmatprep.subr.bf16.mxu1 %v2628_v19  ;;  %v1071_v19 = vld [vmem:[%s4993_s5 + $0x2c0] sm:$0xff]  ;;  %v2658_v54 = vpack.c.bf16 %v1054_v1, %v1053_v63  ;;  %v1056_v61 = vld [vmem:[%s4993_s5 + $0x248] sm:$0xff]  ;;  %v1105_v63 = vld [vmem:[%s4993_s5 + $0x3d0] sm:$0xff] }
 0x288   :  { %v4438_v35 = vadd.f32 %v960_v53, %v4343_v17  ;;  %v2660_v5 = vpack.c.bf16 %v1072_v4, %v1071_v19  ;;  %v1074_v53 = vld [vmem:[%s4993_s5 + $0x2d8] sm:$0xff] }
 0x289   :  { %v1106_v1 = vld [vmem:[%s4993_s5 + $0x3d8] sm:$0xff] }
 0x28a   :  { %2631 = vmatpush3.bf16.msra.mxu1 %v2630_v8  ;;  %v964_v16 = vpop.f32.mrb[26].mxu0  ;;  %v1073_v8 = vld [vmem:[%s4993_s5 + $0x2d0] sm:$0xff]  ;;  %v2696_v4 = vpack.c.bf16 %v1106_v1, %v1105_v63  ;;  %v1123_v63 = vld [vmem:[%s4993_s5 + $0x460] sm:$0xff]  ;;  %v1124_v1 = vld [vmem:[%s4993_s5 + $0x468] sm:$0xff] }
 0x28b   :  { %v2864_v18 = vadd.f32 %v964_v16, %v4339_v57  ;;  %v966_v13 = vpop.f32.mrb[27].mxu0  ;;  %2633 = vmatprep.subr.bf16.mxu1 %v2632_v28  ;;  %v1046_v57 = vld [vmem:[%s4993_s5 + $0x1f8] sm:$0xff]  ;;  %v2662_v28 = vpack.c.bf16 %v1056_v61, %v1055_v12  ;;  %v2664_v11 = vpack.c.bf16 %v1074_v53, %v1073_v8  ;;  %v1076_v16 = vld [vmem:[%s4993_s5 + $0x2e8] sm:$0xff]  ;;  %v1107_v12 = vld [vmem:[%s4993_s5 + $0x3e0] sm:$0xff] }
 0x28c   :  { %v2865_v50 = vadd.f32 %v966_v13, %v4343_v17  ;;  %v2640_v22 = vpack.c.bf16 %v1046_v57, %v1045_v10  ;;  %v1050_v17 = vld [vmem:[%s4993_s5 + $0x218] sm:$0xff]  ;;  %v1059_v13 = vld [vmem:[%s4993_s5 + $0x260] sm:$0xff]  ;;  %v2672_v10 = vpack.c.bf16 %v1078_v20, %v1077_v31  ;;  %v1061_v57 = vld [vmem:[%s4993_s5 + $0x270] sm:$0xff] }
 0x28d   :  { %v981_v48 = vmax.f32 %v2864_v18, 0.0  ;;  %v2650_v21 = vpack.c.bf16 %v1050_v17, %v1049_v41  ;;  %v2668_v18 = vpack.c.bf16 %v1076_v16, %v1075_v49  ;;  %v1083_v41 = vld [vmem:[%s4993_s5 + $0x320] sm:$0xff]  ;;  %v1101_v17 = vld [vmem:[%s4993_s5 + $0x3b0] sm:$0xff]  ;;  %v1108_v61 = vld [vmem:[%s4993_s5 + $0x3e8] sm:$0xff] }
 0x28e   :  { %v982_v37 = vmax.f32 %v2865_v50, 0.0  ;;  %2635 = vmatpush3.bf16.msra.mxu1 %v2634_v6  ;;  %v2666_v6 = vpack.c.bf16 %v1058_v14, %v1057_v29  ;;  %v2686_v42 = vpack.c.bf16 %v1084_v52, %v1083_v41  ;;  %v2700_v53 = vpack.c.bf16 %v1108_v61, %v1107_v12  ;;  %v1109_v29 = vld [vmem:[%s4993_s5 + $0x3f0] sm:$0xff]  ;;  %v1110_v14 = vld [vmem:[%s4993_s5 + $0x3f8] sm:$0xff] }
 0x28f   :  { %2637 = vmatprep.subr.bf16.mxu1 %v2636_v26  ;;  %v1060_v26 = vld [vmem:[%s4993_s5 + $0x268] sm:$0xff]  ;;  %v2704_v16 = vpack.c.bf16 %v1110_v14, %v1109_v29  ;;  %v1125_v12 = vld [vmem:[%s4993_s5 + $0x470] sm:$0xff]  ;;  %v1126_v61 = vld [vmem:[%s4993_s5 + $0x478] sm:$0xff] }
 0x290   :  { %1698 = vmatprep.mubr.f32.mxu0 %v982_v37  ;;  %v2670_v50 = vpack.c.bf16 %v1060_v26, %v1059_v13  ;;  %v1062_v37 = vld [vmem:[%s4993_s5 + $0x278] sm:$0xff]  ;;  %v1127_v13 = vld [vmem:[%s4993_s5 + $0x480] sm:$0xff]  ;;  %v1128_v26 = vld [vmem:[%s4993_s5 + $0x488] sm:$0xff] }
 0x291   :  { %1699 = vmatmul.mubr.f32.vlgmr.msra.gmra.mrb[28].mxu0 %v981_v48  ;;  %v1096_v48 = vld [vmem:[%s4993_s5 + $0x388] sm:$0xff]  ;;  %v2708_v20 = vpack.c.bf16 %v1128_v26, %v1127_v13  ;;  %v1143_v29 = vld [vmem:[%s4993_s5 + $0x500] sm:$0xff]  ;;  %v1145_v26 = vld [vmem:[%s4993_s5 + $0x510] sm:$0xff] }
 0x292   :  { %2639 = vmatpush3.bf16.msra.mxu1 %v2638_v44  ;;  %v1095_v44 = vld [vmem:[%s4993_s5 + $0x380] sm:$0xff]  ;;  %v1144_v14 = vld [vmem:[%s4993_s5 + $0x508] sm:$0xff]  ;;  %2257 = vmatprep.mubr.msk.f32.mxu0 %vm2903_vm0, %v2901_v7 }
 0x293   :  { %2641 = vmatprep.subr.bf16.mxu1 %v2640_v22  ;;  %v2674_v22 = vpack.c.bf16 %v1062_v37, %v1061_v57  ;;  %v2676_v23 = vpack.c.bf16 %v1096_v48, %v1095_v44  ;;  %v1129_v57 = vld [vmem:[%s4993_s5 + $0x490] sm:$0xff]  ;;  %v1130_v37 = vld [vmem:[%s4993_s5 + $0x498] sm:$0xff]  ;;  %v975_v48 = vmax.f32 %v4393_v45, 0.0  ;;  %v1132_v45 = vld [vmem:[%s4993_s5 + $0x4a8] sm:$0xff] }
 0x296   :  { %2643 = vmatpush3.bf16.msra.mxu1 %v2642_v27  ;;  %v1098_v27 = vld [vmem:[%s4993_s5 + $0x398] sm:$0xff] }
 0x297   :  { %2645 = vmatprep.subr.bf16.mxu1 %v2644_v30  ;;  %v2678_v30 = vpack.c.bf16 %v1080_v24, %v1079_v40  ;;  %v2680_v33 = vpack.c.bf16 %v1098_v27, %v1097_v25  ;;  %v1114_v40 = vld [vmem:[%s4993_s5 + $0x418] sm:$0xff]  ;;  %v978_v24 = vmax.f32 %v4420_v3, 0.0  ;;  %v1131_v25 = vld [vmem:[%s4993_s5 + $0x4a0] sm:$0xff]  ;;  %v1116_v3 = vld [vmem:[%s4993_s5 + $0x428] sm:$0xff] }
 0x299   :  { %1349 = vmatmul.mubr.f32.vlgmr.msra.gmra.mrb[16].mxu1 %v971_v2  ;;  %v2682_v2 = vpack.c.bf16 %v1082_v36, %v1081_v34  ;;  %v1134_v34 = vld [vmem:[%s4993_s5 + $0x4b8] sm:$0xff] }
 0x29a   :  { %2647 = vmatpush3.bf16.msra.mxu1 %v2646_v39  ;;  %1418 = vmatprep.mubr.f32.mxu1 %v974_v55  ;;  %v1099_v39 = vld [vmem:[%s4993_s5 + $0x3a0] sm:$0xff]  ;;  %v1102_v55 = vld [vmem:[%s4993_s5 + $0x3b8] sm:$0xff] }
 0x29b   :  { %2649 = vmatprep.subr.bf16.mxu1 %v2648_v62  ;;  %v2684_v62 = vpack.c.bf16 %v1100_v46, %v1099_v39  ;;  %v2688_v43 = vpack.c.bf16 %v1102_v55, %v1101_v17  ;;  %v1117_v39 = vld [vmem:[%s4993_s5 + $0x430] sm:$0xff]  ;;  %v1118_v46 = vld [vmem:[%s4993_s5 + $0x438] sm:$0xff]  ;;  %v1119_v17 = vld [vmem:[%s4993_s5 + $0x440] sm:$0xff] }
 0x29c   :  { %v2722_v41 = vpack.c.bf16 %v1118_v46, %v1117_v39  ;;  %v1120_v55 = vld [vmem:[%s4993_s5 + $0x448] sm:$0xff]  ;;  %v1153_v39 = vld [vmem:[%s4993_s5 + $0x550] sm:$0xff]  ;;  %v1154_v46 = vld [vmem:[%s4993_s5 + $0x558] sm:$0xff] }
 0x29e   :  { %2651 = vmatpush3.bf16.msra.mxu1 %v2650_v21  ;;  %v1085_v21 = vld [vmem:[%s4993_s5 + $0x330] sm:$0xff] }
 0x29f   :  { %2653 = vmatprep.subr.bf16.mxu1 %v2652_v47  ;;  %v1086_v47 = vld [vmem:[%s4993_s5 + $0x338] sm:$0xff] }
 0x2a0   :  { %v2690_v9 = vpack.c.bf16 %v1086_v47, %v1085_v21  ;;  %v2726_v21 = vpack.c.bf16 %v1120_v55, %v1119_v17  ;;  %v1155_v17 = vld [vmem:[%s4993_s5 + $0x560] sm:$0xff]  ;;  %v1156_v55 = vld [vmem:[%s4993_s5 + $0x568] sm:$0xff] }
 0x2a2   :  { %2655 = vmatpush3.bf16.msra.mxu1 %v2654_v59  ;;  %v1087_v59 = vld [vmem:[%s4993_s5 + $0x340] sm:$0xff] }
 0x2a3   :  { %2657 = vmatprep.subr.bf16.mxu1 %v2656_v60  ;;  %v1088_v60 = vld [vmem:[%s4993_s5 + $0x348] sm:$0xff] }
 0x2a4   :  { %v2694_v19 = vpack.c.bf16 %v1088_v60, %v1087_v59  ;;  %v2730_v59 = vpack.c.bf16 %v1122_v56, %v1121_v51  ;;  %v1157_v51 = vld [vmem:[%s4993_s5 + $0x570] sm:$0xff]  ;;  %v1158_v56 = vld [vmem:[%s4993_s5 + $0x578] sm:$0xff] }
 0x2a6   :  { %2659 = vmatpush3.bf16.msra.mxu1 %v2658_v54  ;;  %v1089_v54 = vld [vmem:[%s4993_s5 + $0x350] sm:$0xff] }
 0x2a7   :  { %2661 = vmatprep.subr.bf16.mxu1 %v2660_v5  ;;  %v1090_v5 = vld [vmem:[%s4993_s5 + $0x358] sm:$0xff] }
 0x2a8   :  { %v2698_v8 = vpack.c.bf16 %v1090_v5, %v1089_v54  ;;  %v2734_v54 = vpack.c.bf16 %v1124_v1, %v1123_v63  ;;  %v2902_v1 = vmov 0.0|0.0  }
 0x2a9   :  { %2828 = vmatprep.subr.bf16.mxu0 %v2902_v1 }
 0x2aa   :  { %2663 = vmatpush3.bf16.msra.mxu1 %v2662_v28  ;;  %v1091_v28 = vld [vmem:[%s4993_s5 + $0x360] sm:$0xff] }
 0x2ab   :  { %2665 = vmatprep.subr.bf16.mxu1 %v2664_v11  ;;  %v1092_v11 = vld [vmem:[%s4993_s5 + $0x368] sm:$0xff] }
 0x2ac   :  { %v2702_v49 = vpack.c.bf16 %v1092_v11, %v1091_v28  ;;  %v2738_v28 = vpack.c.bf16 %v1126_v61, %v1125_v12  ;;  %v1709_v61 = vld [vmem:[%s4995_s7 + $0x20] sm:$0xff] }
 0x2ae   :  { %2667 = vmatpush3.bf16.msra.mxu1 %v2666_v6  ;;  %v1093_v6 = vld [vmem:[%s4993_s5 + $0x370] sm:$0xff] }
 0x2af   :  { %2669 = vmatprep.subr.bf16.mxu1 %v2668_v18  ;;  %v1094_v18 = vld [vmem:[%s4993_s5 + $0x378] sm:$0xff] }
 0x2b0   :  { %v2706_v31 = vpack.c.bf16 %v1094_v18, %v1093_v6  ;;  %v2742_v6 = vpack.c.bf16 %v1144_v14, %v1143_v29  ;;  %v977_v18 = vmax.f32 %v4411_v0, 0.0  ;;  %v1164_v0 = vld [vmem:[%s4993_s5 + $0x5a8] sm:$0xff]  ;;  %v1713_v14 = vld [vmem:[%s4995_s7 + $0x40] sm:$0xff] }
 0x2b2   :  { %2671 = vmatpush3.bf16.msra.mxu1 %v2670_v50  ;;  %v1111_v50 = vld [vmem:[%s4993_s5 + $0x400] sm:$0xff] }
 0x2b3   :  { %2673 = vmatprep.subr.bf16.mxu1 %v2672_v10  ;;  %v1112_v10 = vld [vmem:[%s4993_s5 + $0x408] sm:$0xff] }
 0x2b4   :  { %v2710_v44 = vpack.c.bf16 %v1112_v10, %v1111_v50  ;;  %v1163_v50 = vld [vmem:[%s4993_s5 + $0x5a0] sm:$0xff] }
 0x2b6   :  { %2675 = vmatpush3.bf16.msra.mxu1 %v2674_v22  ;;  %v2712_v22 = vpack.c.bf16 %v1130_v37, %v1129_v57  ;;  %v2748_v57 = vpack.c.bf16 %v1164_v0, %v1163_v50  ;;  %v1147_v37 = vld [vmem:[%s4993_s5 + $0x520] sm:$0xff] }
 0x2b7   :  { %2677 = vmatprep.subr.bf16.mxu1 %v2676_v23  ;;  %v1113_v23 = vld [vmem:[%s4993_s5 + $0x410] sm:$0xff]  ;;  %v1908_v50 = vld [vmem:[%s4996_s6] ss:$0 sm:$0xff] }
 0x2b8   :  { %v2714_v27 = vpack.c.bf16 %v1114_v40, %v1113_v23  ;;  %v1149_v40 = vld [vmem:[%s4993_s5 + $0x530] sm:$0xff] }
 0x2b9   :  { %1419 = vmatmul.mubr.f32.vlgmr.msra.gmra.mrb[18].mxu1 %v973_v32  ;;  %v1115_v32 = vld [vmem:[%s4993_s5 + $0x420] sm:$0xff] }
 0x2ba   :  { %2679 = vmatpush3.bf16.msra.mxu1 %v2678_v30  ;;  %1488 = vmatprep.mubr.f32.mxu1 %v976_v38  ;;  %v2716_v30 = vpack.c.bf16 %v1132_v45, %v1131_v25  ;;  %v2718_v36 = vpack.c.bf16 %v1116_v3, %v1115_v32  ;;  %v1167_v25 = vld [vmem:[%s4993_s5 + $0x5c0] sm:$0xff]  ;;  %v1168_v45 = vld [vmem:[%s4993_s5 + $0x5c8] sm:$0xff] }
 0x2bb   :  { %2681 = vmatprep.subr.bf16.mxu1 %v2680_v33  ;;  %v1133_v33 = vld [vmem:[%s4993_s5 + $0x4b0] sm:$0xff]  ;;  %v1151_v32 = vld [vmem:[%s4993_s5 + $0x540] sm:$0xff]  ;;  %v1152_v3 = vld [vmem:[%s4993_s5 + $0x548] sm:$0xff] }
 0x2bc   :  { %v2720_v38 = vpack.c.bf16 %v1134_v34, %v1133_v33  ;;  %v1169_v33 = vld [vmem:[%s4993_s5 + $0x5d0] sm:$0xff]  ;;  %v1170_v34 = vld [vmem:[%s4993_s5 + $0x5d8] sm:$0xff] }
 0x2be   :  { %2683 = vmatpush3.bf16.msra.mxu1 %v2682_v2  ;;  %v1135_v2 = vld [vmem:[%s4993_s5 + $0x4c0] sm:$0xff] }
 0x2bf   :  { %2685 = vmatprep.subr.bf16.mxu1 %v2684_v62  ;;  %v1136_v62 = vld [vmem:[%s4993_s5 + $0x4c8] sm:$0xff] }
 0x2c0   :  { %v2724_v52 = vpack.c.bf16 %v1136_v62, %v1135_v2  ;;  %v1171_v2 = vld [vmem:[%s4993_s5 + $0x5e0] sm:$0xff]  ;;  %v1172_v62 = vld [vmem:[%s4993_s5 + $0x5e8] sm:$0xff] }
 0x2c2   :  { %2687 = vmatpush3.bf16.msra.mxu1 %v2686_v42  ;;  %v1137_v42 = vld [vmem:[%s4993_s5 + $0x4d0] sm:$0xff] }
 0x2c3   :  { %2689 = vmatprep.subr.bf16.mxu1 %v2688_v43  ;;  %v1138_v43 = vld [vmem:[%s4993_s5 + $0x4d8] sm:$0xff] }
 0x2c4   :  { %v2728_v47 = vpack.c.bf16 %v1138_v43, %v1137_v42  ;;  %v1173_v42 = vld [vmem:[%s4993_s5 + $0x5f0] sm:$0xff]  ;;  %v1174_v43 = vld [vmem:[%s4993_s5 + $0x5f8] sm:$0xff] }
 0x2c6   :  { %2691 = vmatpush3.bf16.msra.mxu1 %v2690_v9  ;;  %v1139_v9 = vld [vmem:[%s4993_s5 + $0x4e0] sm:$0xff] }
 0x2c7   :  { %2693 = vmatprep.subr.bf16.mxu1 %v2692_v58  ;;  %v1140_v58 = vld [vmem:[%s4993_s5 + $0x4e8] sm:$0xff] }
 0x2c8   :  { %v2732_v60 = vpack.c.bf16 %v1140_v58, %v1139_v9  ;;  %v2770_v9 = vpack.c.bf16 %v1158_v56, %v1157_v51  ;;  %v979_v58 = vmax.f32 %v4429_v15, 0.0 }
 0x2ca   :  { %2695 = vmatpush3.bf16.msra.mxu1 %v2694_v19  ;;  %v1141_v19 = vld [vmem:[%s4993_s5 + $0x4f0] sm:$0xff] }
 0x2cb   :  { %2697 = vmatprep.subr.bf16.mxu1 %v2696_v4  ;;  %v1142_v4 = vld [vmem:[%s4993_s5 + $0x4f8] sm:$0xff] }
 0x2cc   :  { %v2736_v5 = vpack.c.bf16 %v1142_v4, %v1141_v19  ;;  %v1705_v19 = vld [vmem:[%s4995_s7] sm:$0xff]  ;;  %v1706_v4 = vld [vmem:[%s4995_s7 + $0x8] sm:$0xff] }
 0x2cd   :  { %v2805_v15 = vpack.c.bf16 %v1706_v4, %v1705_v19 }
 0x2ce   :  { %2699 = vmatpush3.bf16.msra.mxu1 %v2698_v8  ;;  %v1159_v8 = vld [vmem:[%s4993_s5 + $0x580] sm:$0xff] }
 0x2cf   :  { %2701 = vmatprep.subr.bf16.mxu1 %v2700_v53  ;;  %v1160_v53 = vld [vmem:[%s4993_s5 + $0x588] sm:$0xff] }
 0x2d0   :  { %v2740_v11 = vpack.c.bf16 %v1160_v53, %v1159_v8  ;;  %v1710_v8 = vld [vmem:[%s4995_s7 + $0x28] sm:$0xff] }
 0x2d1   :  { %v2811_v53 = vpack.c.bf16 %v1710_v8, %v1709_v61 }
 0x2d2   :  { %2703 = vmatpush3.bf16.msra.mxu1 %v2702_v49  ;;  %v1161_v49 = vld [vmem:[%s4993_s5 + $0x590] sm:$0xff] }
 0x2d3   :  { %2705 = vmatprep.subr.bf16.mxu1 %v2704_v16  ;;  %v1162_v16 = vld [vmem:[%s4993_s5 + $0x598] sm:$0xff] }
 0x2d4   :  { %v2744_v13 = vpack.c.bf16 %v1162_v16, %v1161_v49  ;;  %v1714_v49 = vld [vmem:[%s4995_s7 + $0x48] sm:$0xff] }
 0x2d5   :  { %v2817_v16 = vpack.c.bf16 %v1714_v49, %v1713_v14 }
 0x2d6   :  { %2707 = vmatpush3.bf16.msra.mxu1 %v2706_v31  ;;  %v1146_v31 = vld [vmem:[%s4993_s5 + $0x518] sm:$0xff] }
 0x2d7   :  { %2709 = vmatprep.subr.bf16.mxu1 %v2708_v20  ;;  %v980_v20 = vmax.f32 %v4438_v35, 0.0  ;;  %v2746_v10 = vpack.c.bf16 %v1146_v31, %v1145_v26  ;;  %v1148_v35 = vld [vmem:[%s4993_s5 + $0x528] sm:$0xff] }
 0x2d9   :  { %1489 = vmatmul.mubr.f32.vlgmr.msra.gmra.mrb[20].mxu1 %v975_v48  ;;  %v1166_v48 = vld [vmem:[%s4993_s5 + $0x5b8] sm:$0xff] }
 0x2da   :  { %2711 = vmatpush3.bf16.msra.mxu1 %v2710_v44  ;;  %1558 = vmatprep.mubr.f32.mxu1 %v978_v24  ;;  %v1165_v44 = vld [vmem:[%s4993_s5 + $0x5b0] sm:$0xff]  ;;  %v1150_v24 = vld [vmem:[%s4993_s5 + $0x538] sm:$0xff] }
 0x2db   :  { %2713 = vmatprep.subr.bf16.mxu1 %v2712_v22  ;;  %v2750_v22 = vpack.c.bf16 %v1148_v35, %v1147_v37  ;;  %v2752_v23 = vpack.c.bf16 %v1166_v48, %v1165_v44 }
 0x2de   :  { %2715 = vmatpush3.bf16.msra.mxu1 %v2714_v27  ;;  %v2754_v27 = vpack.c.bf16 %v1150_v24, %v1149_v40  ;;  %v1720_v40 = vld [vmem:[%s4995_s7 + $0x78] sm:$0xff] }
 0x2df   :  { %2717 = vmatprep.subr.bf16.mxu1 %v2716_v30  ;;  %v2756_v30 = vpack.c.bf16 %v1168_v45, %v1167_v25  ;;  %v1799_v25 = vld [vmem:[%s4997_s9] sm:$0xff]  ;;  %v1800_v45 = vld [vmem:[%s4997_s9 + $0x8] sm:$0xff] }
 0x2e2   :  { %2719 = vmatpush3.bf16.msra.mxu1 %v2718_v36  ;;  %v2758_v36 = vpack.c.bf16 %v1152_v3, %v1151_v32  ;;  %v1802_v32 = vld [vmem:[%s4997_s9 + $0x18] sm:$0xff] }
 0x2e3   :  { %2721 = vmatprep.subr.bf16.mxu1 %v2720_v38  ;;  %v2760_v38 = vpack.c.bf16 %v1170_v34, %v1169_v33  ;;  %v1804_v33 = vld [vmem:[%s4997_s9 + $0x28] sm:$0xff] }
 0x2e6   :  { %2723 = vmatpush3.bf16.msra.mxu1 %v2722_v41  ;;  %v2762_v41 = vpack.c.bf16 %v1154_v46, %v1153_v39  ;;  %v1807_v46 = vld [vmem:[%s4997_s9 + $0x40] sm:$0xff] }
 0x2e7   :  { %2725 = vmatprep.subr.bf16.mxu1 %v2724_v52  ;;  %v2764_v52 = vpack.c.bf16 %v1172_v62, %v1171_v2  ;;  %v1808_v2 = vld [vmem:[%s4997_s9 + $0x48] sm:$0xff] }
 0x2e8   :  { %v2841_v62 = vpack.c.bf16 %v1808_v2, %v1807_v46 }
 0x2ea   :  { %2727 = vmatpush3.bf16.msra.mxu1 %v2726_v21  ;;  %v2766_v21 = vpack.c.bf16 %v1156_v55, %v1155_v17  ;;  %v1811_v55 = vld [vmem:[%s4997_s9 + $0x60] sm:$0xff] }
 0x2eb   :  { %2729 = vmatprep.subr.bf16.mxu1 %v2728_v47  ;;  %v2768_v47 = vpack.c.bf16 %v1174_v43, %v1173_v42  ;;  %v1812_v42 = vld [vmem:[%s4997_s9 + $0x68] sm:$0xff] }
 0x2ec   :  { %v2847_v51 = vpack.c.bf16 %v1812_v42, %v1811_v55 }
 0x2ee   :  { %2731 = vmatpush3.bf16.msra.mxu1 %v2730_v59 }
 0x2ef   :  { %2733 = vmatprep.subr.bf16.mxu1 %v2732_v60 }
 0x2f2   :  { %2735 = vmatpush3.bf16.msra.mxu1 %v2734_v54  ;;  %v1707_v54 = vld [vmem:[%s4995_s7 + $0x10] sm:$0xff] }
 0x2f3   :  { %2737 = vmatprep.subr.bf16.mxu1 %v2736_v5  ;;  %v1708_v5 = vld [vmem:[%s4995_s7 + $0x18] sm:$0xff] }
 0x2f4   :  { %v2808_v12 = vpack.c.bf16 %v1708_v5, %v1707_v54 }
 0x2f6   :  { %2739 = vmatpush3.bf16.msra.mxu1 %v2738_v28  ;;  %v1711_v28 = vld [vmem:[%s4995_s7 + $0x30] sm:$0xff] }
 0x2f7   :  { %2741 = vmatprep.subr.bf16.mxu1 %v2740_v11  ;;  %v1712_v11 = vld [vmem:[%s4995_s7 + $0x38] sm:$0xff] }
 0x2f8   :  { %v2814_v29 = vpack.c.bf16 %v1712_v11, %v1711_v28  ;;  %v1814_v28 = vld [vmem:[%s4997_s9 + $0x78] sm:$0xff] }
 0x2f9   :  { %1559 = vmatmul.mubr.f32.vlgmr.msra.gmra.mrb[22].mxu1 %v977_v18  ;;  %v1716_v18 = vld [vmem:[%s4995_s7 + $0x58] sm:$0xff] }
 0x2fa   :  { %2743 = vmatpush3.bf16.msra.mxu1 %v2742_v6  ;;  %1628 = vmatprep.mubr.f32.mxu1 %v980_v20  ;;  %v1715_v6 = vld [vmem:[%s4995_s7 + $0x50] sm:$0xff] }
 0x2fb   :  { %2745 = vmatprep.subr.bf16.mxu1 %v2744_v13  ;;  %v2820_v26 = vpack.c.bf16 %v1716_v18, %v1715_v6  ;;  %v1910_v18 = vld [vmem:[%s4999_s10] ss:$0 sm:$0xff] }
 0x2fe   :  { %2747 = vmatpush3.bf16.msra.mxu1 %v2746_v10  ;;  %v1717_v10 = vld [vmem:[%s4995_s7 + $0x60] sm:$0xff] }
 0x2ff   :  { %2749 = vmatprep.subr.bf16.mxu1 %v2748_v57  ;;  %v1718_v57 = vld [vmem:[%s4995_s7 + $0x68] sm:$0xff] }
 0x300   :  { %v2823_v35 = vpack.c.bf16 %v1718_v57, %v1717_v10 }
 0x302   :  { %2751 = vmatpush3.bf16.msra.mxu1 %v2750_v22 }
 0x303   :  { %2753 = vmatprep.subr.bf16.mxu1 %v2752_v23  ;;  %v1719_v23 = vld [vmem:[%s4995_s7 + $0x70] sm:$0xff] }
 0x304   :  { %v2826_v24 = vpack.c.bf16 %v1720_v40, %v1719_v23 }
 0x306   :  { %2755 = vmatpush3.bf16.msra.mxu1 %v2754_v27  ;;  %v1801_v27 = vld [vmem:[%s4997_s9 + $0x10] sm:$0xff] }
 0x307   :  { %2757 = vmatprep.subr.bf16.mxu1 %v2756_v30  ;;  %v2829_v30 = vpack.c.bf16 %v1800_v45, %v1799_v25  ;;  %v2832_v3 = vpack.c.bf16 %v1802_v32, %v1801_v27 }
 0x309   :  { %2830 = vmatpush3.bf16.msra.mxu0 %v2829_v30 }
 0x30a   :  { %2759 = vmatpush3.bf16.msra.mxu1 %v2758_v36  ;;  %2831 = vmatprep.subr.bf16.mxu0 %v2902_v1  ;;  %v1805_v36 = vld [vmem:[%s4997_s9 + $0x30] sm:$0xff] }
 0x30b   :  { %2761 = vmatprep.subr.bf16.mxu1 %v2760_v38  ;;  %v1806_v38 = vld [vmem:[%s4997_s9 + $0x38] sm:$0xff] }
 0x30c   :  { %v2838_v39 = vpack.c.bf16 %v1806_v38, %v1805_v36 }
 0x30d   :  { %2833 = vmatpush3.bf16.msra.mxu0 %v2832_v3 }
 0x30e   :  { %2763 = vmatpush3.bf16.msra.mxu1 %v2762_v41  ;;  %2834 = vmatprep.subr.bf16.mxu0 %v2902_v1  ;;  %v1809_v41 = vld [vmem:[%s4997_s9 + $0x50] sm:$0xff] }
 0x30f   :  { %2765 = vmatprep.subr.bf16.mxu1 %v2764_v52  ;;  %v1810_v52 = vld [vmem:[%s4997_s9 + $0x58] sm:$0xff] }
 0x310   :  { %v2844_v17 = vpack.c.bf16 %v1810_v52, %v1809_v41 }
 0x312   :  { %2767 = vmatpush3.bf16.msra.mxu1 %v2766_v21 }
 0x313   :  { %2769 = vmatprep.subr.bf16.mxu1 %v2768_v47 }
 0x316   :  { %2771 = vmatpush3.bf16.msra.mxu1 %v2770_v9 }
 0x317   :  { %2804 = vmatprep.subr.bf16.mxu1 %v2902_v1 }
 0x319   :  { %1629 = vmatmul.mubr.f32.vlgmr.msra.gmra.mrb[24].mxu1 %v979_v58 }
 0x31a   :  { %2806 = vmatpush3.bf16.msra.mxu1 %v2805_v15  ;;  %2222 = vmatprep.mubr.msk.f32.mxu1 %vm2903_vm0, %v2901_v7  ;;  %v1803_v7 = vld [vmem:[%s4997_s9 + $0x20] sm:$0xff] }
 0x31b   :  { %2807 = vmatprep.subr.bf16.mxu1 %v2902_v1  ;;  %v2835_v34 = vpack.c.bf16 %v1804_v33, %v1803_v7 }
 0x31d   :  { %2836 = vmatpush3.bf16.msra.mxu0 %v2835_v34 }
 0x31e   :  { %2809 = vmatpush3.bf16.msra.mxu1 %v2808_v12  ;;  %2837 = vmatprep.subr.bf16.mxu0 %v2902_v1 }
 0x31f   :  { %2810 = vmatprep.subr.bf16.mxu1 %v2902_v1 }
 0x321   :  { %2839 = vmatpush3.bf16.msra.mxu0 %v2838_v39 }
 0x322   :  { %2812 = vmatpush3.bf16.msra.mxu1 %v2811_v53  ;;  %2840 = vmatprep.subr.bf16.mxu0 %v2902_v1 }
 0x323   :  { %2813 = vmatprep.subr.bf16.mxu1 %v2902_v1 }
 0x325   :  { %2842 = vmatpush3.bf16.msra.mxu0 %v2841_v62 }
 0x326   :  { %2815 = vmatpush3.bf16.msra.mxu1 %v2814_v29  ;;  %2843 = vmatprep.subr.bf16.mxu0 %v2902_v1  ;;  %v1909_v29 = vld [vmem:[%s4998_s8] ss:$0 sm:$0xff] }
 0x327   :  { %2816 = vmatprep.subr.bf16.mxu1 %v2902_v1 }
 0x329   :  { %2845 = vmatpush3.bf16.msra.mxu0 %v2844_v17 }
 0x32a   :  { %2818 = vmatpush3.bf16.msra.mxu1 %v2817_v16  ;;  %2846 = vmatprep.subr.bf16.mxu0 %v2902_v1 }
 0x32b   :  { %2819 = vmatprep.subr.bf16.mxu1 %v2902_v1 }
 0x32d   :  { %2848 = vmatpush3.bf16.msra.mxu0 %v2847_v51 }
 0x32e   :  { %2821 = vmatpush3.bf16.msra.mxu1 %v2820_v26  ;;  %2849 = vmatprep.subr.bf16.mxu0 %v2902_v1 }
 0x32f   :  { %2822 = vmatprep.subr.bf16.mxu1 %v2902_v1 }
 0x332   :  { %2824 = vmatpush3.bf16.msra.mxu1 %v2823_v35 }
 0x333   :  { %2825 = vmatprep.subr.bf16.mxu1 %v2902_v1  ;;  %v1813_v1 = vld [vmem:[%s4997_s9 + $0x70] sm:$0xff] }
 0x334   :  { %v2850_v11 = vpack.c.bf16 %v1814_v28, %v1813_v1 }
 0x336   :  { %2827 = vmatpush3.bf16.msra.mxu1 %v2826_v24  ;;  %2851 = vmatpush3.bf16.msra.mxu0 %v2850_v11 }
 0x34c   :  { %v1943_v59 = vpop.f32.mrb[14].mxu1 }
 0x34d   :  { %v1944_v60 = vpop.f32.mrb[15].mxu1 }
 0x34e   :  { %v1945_v63 = vadd.f32 %v1944_v60, %v1943_v59 }
 0x350   :  { %v1281_v44 = vadd.f32 %v1945_v63, %v1908_v50 }
 0x364   :  { %v2153_v13 = vpop.f32.mrb[28].mxu0 }
 0x365   :  { %v2154_v31 = vpop.f32.mrb[29].mxu0 }
 0x366   :  { %v4903_v20 = vadd.f32 %v2154_v31, %v2153_v13 }
 0x36c   :  { %v1978_v0 = vpop.f32.mrb[16].mxu1 }
 0x36d   :  { %v1979_v37 = vpop.f32.mrb[17].mxu1 }
 0x36e   :  { %v1980_v48 = vadd.f32 %v1979_v37, %v1978_v0 }
 0x370   :  { %v1351_v22 = vadd.f32 %v1980_v48, %v1281_v44 }
 0x38c   :  { %v2013_v43 = vpop.f32.mrb[18].mxu1 }
 0x38d   :  { %v2014_v21 = vpop.f32.mrb[19].mxu1 }
 0x38e   :  { %v2015_v47 = vadd.f32 %v2014_v21, %v2013_v43 }
 0x390   :  { %v1421_v56 = vadd.f32 %v2015_v47, %v1351_v22 }
 0x3ac   :  { %v2048_v9 = vpop.f32.mrb[20].mxu1 }
 0x3ad   :  { %v2049_v58 = vpop.f32.mrb[21].mxu1 }
 0x3ae   :  { %v2050_v59 = vadd.f32 %v2049_v58, %v2048_v9 }
 0x3b0   :  { %v1491_v60 = vadd.f32 %v2050_v59, %v1421_v56 }
 0x3cc   :  { %v2083_v63 = vpop.f32.mrb[22].mxu1 }
 0x3cd   :  { %v2084_v19 = vpop.f32.mrb[23].mxu1 }
 0x3ce   :  { %v2085_v4 = vadd.f32 %v2084_v19, %v2083_v63 }
 0x3d0   :  { %v1561_v54 = vadd.f32 %v2085_v4, %v1491_v60 }
 0x3ec   :  { %v2118_v15 = vpop.f32.mrb[24].mxu1 }
 0x3ed   :  { %v2119_v5 = vpop.f32.mrb[25].mxu1 }
 0x3ee   :  { %v2120_v12 = vadd.f32 %v2119_v5, %v2118_v15 }
 0x3f0   :  { %v1631_v61 = vadd.f32 %v2120_v12, %v1561_v54 }
 0x3f2   :  { %v1701_v8 = vadd.f32 %v4903_v20, %v1631_v61 }
 0x3f4   :  { %v1704_v53 = vmax.f32 %v1701_v8, 0.0 }
 0x3f6   :  { %2223 = vmatmul.mubr.f32.vlgmr.msra.gmra.mrb[26].mxu1 %v1704_v53 }
 0x4c9   :  { %v1794_v14 = vpop.f32.mrb[26].mxu1 }
 0x4ca   :  { %v1795_v49 = vadd.f32 %v1909_v29, %v1794_v14  ;;  %v2224_v16 = vpop.f32.mrb[27].mxu1 }
 0x4cc   :  { %v1798_v6 = vmax.f32 %v1795_v49, 0.0 }
 0x4ce   :  { %2258 = vmatmul.mubr.f32.vlgmr.msra.gmra.mrb[30].mxu0 %v1798_v6 }
 0x5a1   :  { %v1888_v13 = vpop.f32.mrb[30].mxu0 }
 0x5a2   :  { %v1889_v26 = vadd.f32 %v1910_v18, %v1888_v13  ;;  %v2259_v31 = vpop.f32.mrb[31].mxu0 }
 0x5a4   :  { %1892 = vmax.xlane.f32.xlu0 %v1889_v26 }
 0x631   :  { %v1893_v20 = vpop.xlane.xlu0 %1892 }
 0x632   :  { %v1894_v50 = vsub.f32 %v1889_v26, %v1893_v20 }
 0x634   :  { %v1895_v0 = vmul.f32 1.442695, %v1894_v50 }
 0x636   :  { %2897 = vpow2.f32 %v1895_v0 }
 0x640   :  { %v2898_v10 = vpop.eup %2897 }
 0x641   :  { %1897 = vadd.xlane.f32.xlu0 %v2898_v10 }
 0x6ce   :  { %v1898_v57 = vpop.xlane.xlu0 %1897 }
 0x6cf   :  { %2899 = vlog2.f32 %v1898_v57 }
 0x6d9   :  { %v2900_v37 = vpop.eup %2899 }
 0x6da   :  { %v1900_v35 = vmul.f32 0.6931472, %v2900_v37 }
 0x6dc   :  { %v1901_v44 = vadd.f32 %v1900_v35, %v1893_v20 }
 0x6de   :  { %v1902_v48 = vsub.f32 %v1889_v26, %v1901_v44 }
 0x6e0   :  { %1903 = vst [vmem:[%s5000_s11] sm:$0xff] %v1902_v48 }

</bundles_post_ra>
